<compile_context>
chip_gen: v7x
topology: tpu7x:2x2x1
jax: 0.10.0
libtpu: 0.0.40
codegen_flags: <defaults>
</compile_context>

<pallas_src>
import functools
import math

import jax
import jax.numpy as jnp
from jax.experimental import pallas as pl
from jax.experimental.pallas import tpu as pltpu


# 48 MiB leaves headroom inside v7x's 64 MiB physical VMEM; on v5e/v6e
# (128 MiB physical) this could be raised further if tiles are enlarged.
_VMEM_LIMIT_BYTES = 48 * 1024 * 1024
# PyTorch nn.LayerNorm default eps.
_LN_EPS = 1e-5


def _pick_tile(dim, target, align):
    """Largest multiple of `align` (<= target) dividing `dim`, else full dim.

    The full-dim fallback is always legal (a block equal to the array dim
    satisfies the (8,128) rule); callers pad the row dimension to a multiple
    of 8 so the row axis never collapses to a single monolithic block.
    """
    if dim <= target:
        return dim
    if dim % align:
        return dim
    t = (min(target, dim) // align) * align
    while t > align and dim % t:
        t -= align
    return t if dim % t == 0 else dim


# ----------------------------------------------------------------------------
# Pallas kernels
# ----------------------------------------------------------------------------

def layernorm_kernel(x_ref, g_ref, b_ref, o_ref, *, eps):
    x = x_ref[...]                                        # (tm, D) f32
    mean = jnp.mean(x, axis=-1, keepdims=True)
    var = jnp.mean((x - mean) ** 2, axis=-1, keepdims=True)
    o_ref[...] = (x - mean) * jax.lax.rsqrt(var + eps) * g_ref[...] + b_ref[...]


def ln_qkv_kernel(x_ref, g_ref, b_ref, w_ref, bias_ref, q_ref, k_ref, v_ref,
                  *, eps, hdk):
    # Fused LayerNorm -> [Wq|Wk|Wv] projection; emits q/k/v as separate
    # lane-dense bf16 slabs so downstream kernels never transpose in JAX.
    x = x_ref[...]                                        # (tm, D) f32
    mean = jnp.mean(x, axis=-1, keepdims=True)
    var = jnp.mean((x - mean) ** 2, axis=-1, keepdims=True)
    xn = (x - mean) * jax.lax.rsqrt(var + eps) * g_ref[...] + b_ref[...]
    y = (jnp.dot(xn.astype(jnp.bfloat16), w_ref[...],
                 preferred_element_type=jnp.float32) + bias_ref[...])
    q_ref[...] = y[:, :hdk].astype(q_ref.dtype)
    k_ref[...] = y[:, hdk:2 * hdk].astype(k_ref.dtype)
    v_ref[...] = y[:, 2 * hdk:].astype(v_ref.dtype)


def attn_kernel(q_ref, k_ref, v_ref, mask_ref, o_ref, m_ref, l_ref, acc_ref,
                *, num_heads, d_k, scale):
    # Flash-style attention over (B, q-tile, kv-tile) grid.  Heads are handled
    # by a static loop on 2-D slabs (no 3-D reshapes/transposes); running
    # softmax stats live in VMEM scratch; output is written lane-dense
    # (tq, H*dk) once per q tile.
    ki = pl.program_id(2)

    @pl.when(ki == 0)
    def _():
        m_ref[...] = jnp.full_like(m_ref, -jnp.inf)
        l_ref[...] = jnp.zeros_like(l_ref)
        acc_ref[...] = jnp.zeros_like(acc_ref)

    mask = mask_ref[0]                                    # (1, tkv) additive

    for h in range(num_heads):
        sl = slice(h * d_k, (h + 1) * d_k)
        q = q_ref[:, sl]                                  # (tq, dk) bf16
        k = k_ref[:, sl]                                  # (tkv, dk) bf16
        v = v_ref[:, sl]                                  # (tkv, dk) bf16
        # NOTE: at realistic sizes d_k should be a multiple of 128 so this
        # contraction fills the MXU and lanes; demo shapes are tiny.
        s = jax.lax.dot_general(q, k, (((1,), (1,)), ((), ())),
                                preferred_element_type=jnp.float32)
        s = s * scale + mask                              # (tq, tkv)

        m_prev = m_ref[:, h:h + 1]                        # (tq, 1)
        m_new = jnp.maximum(m_prev, jnp.max(s, axis=-1, keepdims=True))
        alpha = jnp.exp(m_prev - m_new)
        p = jnp.exp(s - m_new)
        l_ref[:, h:h + 1] = alpha * l_ref[:, h:h + 1] + jnp.sum(
            p, axis=-1, keepdims=True)
        acc_ref[:, sl] = alpha * acc_ref[:, sl] + jnp.dot(
            p.astype(jnp.bfloat16), v, preferred_element_type=jnp.float32)
        m_ref[:, h:h + 1] = m_new

    @pl.when(ki == pl.num_programs(2) - 1)
    def _():
        parts = []
        for h in range(num_heads):
            sl = slice(h * d_k, (h + 1) * d_k)
            inv = pl.reciprocal(l_ref[:, h:h + 1], approx=False)
            parts.append(acc_ref[:, sl] * inv)
        o_ref[...] = jnp.concatenate(parts, axis=-1).astype(o_ref.dtype)


def linear_residual_kernel(x_ref, w_ref, b_ref, r_ref, o_ref, acc_ref):
    # Tiled (M,N,K) matmul with f32 accumulator; bias + residual in epilogue.
    @pl.when(pl.program_id(2) == 0)
    def _():
        acc_ref[...] = jnp.zeros_like(acc_ref)

    acc_ref[...] += jnp.dot(x_ref[...].astype(jnp.bfloat16), w_ref[...],
                            preferred_element_type=jnp.float32)

    @pl.when(pl.program_id(2) == pl.num_programs(2) - 1)
    def _():
        o_ref[...] = acc_ref[...] + b_ref[...] + r_ref[...]


def ln_ffn_kernel(x_ref, g_ref, b_ref, w1_ref, b1_ref, w2_ref, b2_ref, o_ref,
                  xn_ref, acc_ref, *, eps):
    # Fused LayerNorm -> Linear -> ReLU -> Linear -> +residual, with the d_ff
    # dimension split across grid axis 1 so w1/w2 are streamed in slices
    # (never fully resident in VMEM).  LN(x) is computed once per row tile and
    # cached in bf16 scratch.
    f = pl.program_id(1)

    @pl.when(f == 0)
    def _():
        x = x_ref[...]                                    # (tm, D) f32
        mean = jnp.mean(x, axis=-1, keepdims=True)
        var = jnp.mean((x - mean) ** 2, axis=-1, keepdims=True)
        xn_ref[...] = ((x - mean) * jax.lax.rsqrt(var + eps) * g_ref[...]
                       + b_ref[...]).astype(xn_ref.dtype)
        acc_ref[...] = jnp.zeros_like(acc_ref)

    h = (jnp.dot(xn_ref[...], w1_ref[...],
                 preferred_element_type=jnp.float32) + b1_ref[...])
    h = jnp.maximum(h, 0.0)
    acc_ref[...] += jnp.dot(h.astype(jnp.bfloat16), w2_ref[...],
                            preferred_element_type=jnp.float32)

    @pl.when(f == pl.num_programs(1) - 1)
    def _():
        o_ref[...] = x_ref[...] + acc_ref[...] + b2_ref[...]


# ----------------------------------------------------------------------------
# Pallas wrappers
# ----------------------------------------------------------------------------

def layer_norm(x2, g, b, *, eps=_LN_EPS, tm=512):
    M, D = x2.shape
    tm = _pick_tile(M, tm, 8)
    return pl.pallas_call(
        functools.partial(layernorm_kernel, eps=eps),
        out_shape=jax.ShapeDtypeStruct((M, D), jnp.float32),
        grid=(M // tm,),
        in_specs=[
            pl.BlockSpec((tm, D), lambda i: (i, 0)),
            pl.BlockSpec((1, D), lambda i: (0, 0)),
            pl.BlockSpec((1, D), lambda i: (0, 0)),
        ],
        out_specs=pl.BlockSpec((tm, D), lambda i: (i, 0)),
        compiler_params=pltpu.CompilerParams(
            dimension_semantics=("parallel",),
            vmem_limit_bytes=_VMEM_LIMIT_BYTES),
    )(x2, g, b)


def ln_qkv(x2, g, b, w, bias, *, hdk, eps=_LN_EPS, tm=256):
    M, D = x2.shape
    N = w.shape[1]                                        # 3 * hdk
    tm = _pick_tile(M, tm, 8)
    # TODO(synk): mark the constant weight/bias/gamma/beta specs with
    # pipeline_mode=pl.Buffered(1) to drop their second pipeline buffer.
    return pl.pallas_call(
        functools.partial(ln_qkv_kernel, eps=eps, hdk=hdk),
        out_shape=(jax.ShapeDtypeStruct((M, hdk), jnp.bfloat16),
                   jax.ShapeDtypeStruct((M, hdk), jnp.bfloat16),
                   jax.ShapeDtypeStruct((M, hdk), jnp.bfloat16)),
        grid=(M // tm,),
        in_specs=[
            pl.BlockSpec((tm, D), lambda i: (i, 0)),
            pl.BlockSpec((1, D), lambda i: (0, 0)),
            pl.BlockSpec((1, D), lambda i: (0, 0)),
            pl.BlockSpec((D, N), lambda i: (0, 0)),     # fused QKV weight
            pl.BlockSpec((1, N), lambda i: (0, 0)),
        ],
        out_specs=[
            pl.BlockSpec((tm, hdk), lambda i: (i, 0)),
            pl.BlockSpec((tm, hdk), lambda i: (i, 0)),
            pl.BlockSpec((tm, hdk), lambda i: (i, 0)),
        ],
        compiler_params=pltpu.CompilerParams(
            dimension_semantics=("parallel",),
            vmem_limit_bytes=_VMEM_LIMIT_BYTES),
    )(x2, g, b, w, bias)


def attention(q2, k2, v2, mask_add, *, batch, seq, num_heads, d_k,
              tq=256, tkv=512):
    # q2,k2,v2: (B*seq, H*dk) bf16; mask_add: (B, 1, seq) f32 additive
    # (0.0 keep / -1e9 drop).  Grid = (B, q tiles, kv tiles); kv axis is the
    # online-softmax reduction axis.
    M, hdk = q2.shape
    scale = 1.0 / math.sqrt(d_k)
    tq = _pick_tile(seq, tq, 8)
    tkv = _pick_tile(seq, tkv, 128)
    nq = seq // tq
    nk = seq // tkv
    return pl.pallas_call(
        functools.partial(attn_kernel, num_heads=num_heads, d_k=d_k,
                          scale=scale),
        out_shape=jax.ShapeDtypeStruct((M, hdk), jnp.bfloat16),
        grid_spec=pltpu.PrefetchScalarGridSpec(
            num_scalar_prefetch=0,
            grid=(batch, nq, nk),
            in_specs=[
                pl.BlockSpec((tq, hdk), lambda b, qi, ki: (b * nq + qi, 0)),
                pl.BlockSpec((tkv, hdk), lambda b, qi, ki: (b * nk + ki, 0)),
                pl.BlockSpec((tkv, hdk), lambda b, qi, ki: (b * nk + ki, 0)),
                pl.BlockSpec((1, 1, tkv), lambda b, qi, ki: (b, 0, ki)),
            ],
            out_specs=pl.BlockSpec((tq, hdk),
                                   lambda b, qi, ki: (b * nq + qi, 0)),
            scratch_shapes=[
                pltpu.VMEM((tq, num_heads), jnp.float32),   # running max
                pltpu.VMEM((tq, num_heads), jnp.float32),   # running sum
                pltpu.VMEM((tq, hdk), jnp.float32),         # output accum
            ],
        ),
        compiler_params=pltpu.CompilerParams(
            dimension_semantics=("parallel", "parallel", "arbitrary"),
            vmem_limit_bytes=_VMEM_LIMIT_BYTES),
    )(q2, k2, v2, mask_add)


def linear_residual(x2, w, b, res, *, tm=512, tn=512, tk=512):
    # out = x2 @ w + b + res, tiled over (M, N, K) with a VMEM accumulator.
    M, K = x2.shape
    N = w.shape[1]
    tm = _pick_tile(M, tm, 8)
    tn = _pick_tile(N, tn, 128)
    tk = _pick_tile(K, tk, 128)
    grid = (M // tm, N // tn, K // tk)
    return pl.pallas_call(
        linear_residual_kernel,
        out_shape=jax.ShapeDtypeStruct((M, N), jnp.float32),
        grid_spec=pltpu.PrefetchScalarGridSpec(
            num_scalar_prefetch=0,
            grid=grid,
            in_specs=[
                pl.BlockSpec((tm, tk), lambda i, j, kk: (i, kk)),
                pl.BlockSpec((tk, tn), lambda i, j, kk: (kk, j)),
                pl.BlockSpec((1, tn), lambda i, j, kk: (0, j)),
                pl.BlockSpec((tm, tn), lambda i, j, kk: (i, j)),
            ],
            out_specs=pl.BlockSpec((tm, tn), lambda i, j, kk: (i, j)),
            scratch_shapes=[pltpu.VMEM((tm, tn), jnp.float32)],
        ),
        compiler_params=pltpu.CompilerParams(
            dimension_semantics=("parallel", "parallel", "arbitrary"),
            vmem_limit_bytes=_VMEM_LIMIT_BYTES),
    )(x2, w, b, res)


def ln_ffn(x2, g, b, w1, b1, w2, b2, *, eps=_LN_EPS, tm=256, tff=512):
    M, D = x2.shape
    Dff = w1.shape[1]
    tm = _pick_tile(M, tm, 8)
    tff = _pick_tile(Dff, tff, 128)
    grid = (M // tm, Dff // tff)
    return pl.pallas_call(
        functools.partial(ln_ffn_kernel, eps=eps),
        out_shape=jax.ShapeDtypeStruct((M, D), jnp.float32),
        grid_spec=pltpu.PrefetchScalarGridSpec(
            num_scalar_prefetch=0,
            grid=grid,
            in_specs=[
                pl.BlockSpec((tm, D), lambda i, f: (i, 0)),
                pl.BlockSpec((1, D), lambda i, f: (0, 0)),
                pl.BlockSpec((1, D), lambda i, f: (0, 0)),
                pl.BlockSpec((D, tff), lambda i, f: (0, f)),   # stream w1
                pl.BlockSpec((1, tff), lambda i, f: (0, f)),
                pl.BlockSpec((tff, D), lambda i, f: (f, 0)),   # stream w2
                pl.BlockSpec((1, D), lambda i, f: (0, 0)),
            ],
            out_specs=pl.BlockSpec((tm, D), lambda i, f: (i, 0)),
            scratch_shapes=[
                pltpu.VMEM((tm, D), jnp.bfloat16),   # cached LN(x) MXU input
                pltpu.VMEM((tm, D), jnp.float32),    # 2nd-matmul accumulator
            ],
        ),
        compiler_params=pltpu.CompilerParams(
            dimension_semantics=("parallel", "arbitrary"),
            vmem_limit_bytes=_VMEM_LIMIT_BYTES),
    )(x2, g, b, w1, b1, w2, b2)


# ----------------------------------------------------------------------------
# Transformer encoder (parameters + forward)
# ----------------------------------------------------------------------------

def encoder_forward(x, e_mask, params, num_heads, d_k):
    B, S, D = x.shape
    hdk = num_heads * d_k

    # Pad the sequence to a multiple of 8 so row tiles stay (8,128)-aligned;
    # padded key positions are masked out, padded query rows are sliced off.
    S_pad = ((S + 7) // 8) * 8
    if S_pad != S:
        x = jnp.pad(x, ((0, 0), (0, S_pad - S), (0, 0)))
    keep = jnp.reshape(e_mask.astype(jnp.float32), (B, 1, S))
    if S_pad != S:
        keep = jnp.pad(keep, ((0, 0), (0, 0), (0, S_pad - S)))
    # Additive mask: 0.0 keep / -1e9 drop (single add in-kernel, no select).
    mask_add = (keep - 1.0) * 1e9

    M = B * S_pad
    x2 = x.reshape(M, D)

    for p in params["layers"]:
        # ---- pre-norm multi-head self attention ----
        q2, k2, v2 = ln_qkv(x2, p["ln1_g"], p["ln1_b"],
                            p["w_qkv"], p["b_qkv"], hdk=hdk)
        ctx = attention(q2, k2, v2, mask_add, batch=B, seq=S_pad,
                        num_heads=num_heads, d_k=d_k)       # (M, H*dk) bf16
        # output projection + bias + residual fused
        x2 = linear_residual(ctx, p["w_o"], p["b_o"], x2)

        # ---- pre-norm feed forward (LN + FFN + residual fused, d_ff split) --
        x2 = ln_ffn(x2, p["ln2_g"], p["ln2_b"],
                    p["ff_w1"], p["ff_b1"], p["ff_w2"], p["ff_b2"])

    out = layer_norm(x2, params["ln_g"], params["ln_b"])
    out = out.reshape(B, S_pad, D)
    if S_pad != S:
        out = out[:, :S, :]
    return out


def init_params(key, num_layers, d_model, num_heads, d_k, d_ff):
    scale = 0.02

    def dense(k, din, dout):
        # weights stored bf16 (MXU inputs); biases f32 (epilogue adds).
        w = (scale * jax.random.normal(k, (din, dout), jnp.float32)
             ).astype(jnp.bfloat16)
        b = jnp.zeros((1, dout), jnp.float32)
        return w, b

    layers = []
    for _ in range(num_layers):
        key, k_qkv, k_o, k_f1, k_f2 = jax.random.split(key, 5)
        p = {}
        p["ln1_g"] = jnp.ones((1, d_model), jnp.float32)
        p["ln1_b"] = jnp.zeros((1, d_model), jnp.float32)
        p["ln2_g"] = jnp.ones((1, d_model), jnp.float32)
        p["ln2_b"] = jnp.zeros((1, d_model), jnp.float32)
        # fused [Wq | Wk | Wv] -> one wide matmul
        p["w_qkv"], p["b_qkv"] = dense(k_qkv, d_model, 3 * num_heads * d_k)
        p["w_o"], p["b_o"] = dense(k_o, num_heads * d_k, d_model)
        p["ff_w1"], p["ff_b1"] = dense(k_f1, d_model, d_ff)
        p["ff_w2"], p["ff_b2"] = dense(k_f2, d_ff, d_model)
        layers.append(p)

    return {
        "layers": layers,
        "ln_g": jnp.ones((1, d_model), jnp.float32),
        "ln_b": jnp.zeros((1, d_model), jnp.float32),
    }


# ----------------------------------------------------------------------------
# Demo
# ----------------------------------------------------------------------------

if __name__ == "__main__":
    num_layers = 2
    d_model = 32
    num_heads = 4
    d_k = d_model // num_heads
    d_ff = 64
    B = 2
    S = 8

    root = jax.random.PRNGKey(0)
    k_x, k_p = jax.random.split(root, 2)

    x = jax.random.normal(k_x, (B, S, d_model), jnp.float32)
    # Source padding mask (B, 1, 1, S): 1.0 keep / 0.0 pad. Pad last 2 tokens
    # of the second sequence.
    e_mask = jnp.ones((B, 1, 1, S), jnp.float32)
    e_mask = e_mask.at[1, :, :, S - 2:].set(0.0)

    params = init_params(k_p, num_layers, d_model, num_heads, d_k, d_ff)

    # TODO(synk): nn.Dropout layers are inference no-ops and are omitted.
    fwd = jax.jit(
        functools.partial(encoder_forward, num_heads=num_heads, d_k=d_k)
    )
    out = fwd(x, e_mask, params)
    out = jax.block_until_ready(out)
    assert out.shape == (B, S, d_model)
    assert bool(jnp.all(jnp.isfinite(out)))
    print("KERNEL_OK")
</pallas_src>

<mosaic_0001>
module attributes {stable_mosaic.version = 11 : i64} {
  func.func @linear_residual_kernel(%arg0: i32, %arg1: i32, %arg2: i32, %arg3: memref<16x32xbf16, #tpu.memory_space<vmem>>, %arg4: memref<32x32xbf16, #tpu.memory_space<vmem>>, %arg5: memref<1x32xf32, #tpu.memory_space<vmem>>, %arg6: memref<16x32xf32, #tpu.memory_space<vmem>>, %arg7: memref<16x32xf32, #tpu.memory_space<vmem>>, %arg8: memref<16x32xf32, #tpu.memory_space<vmem>>) attributes {dimension_semantics = [#tpu.dimension_semantics<parallel>, #tpu.dimension_semantics<parallel>, #tpu.dimension_semantics<arbitrary>], iteration_bounds = array<i64: 1, 1, 1>, scalar_prefetch = 0 : i64, scratch_operands = 1 : i64, tpu.core_type = #tpu.core_type<tc>, window_params = [{transform_indices = @transform_0, window_bounds = array<i64: 16, 32>}, {transform_indices = @transform_1, window_bounds = array<i64: 32, 32>}, {transform_indices = @transform_2, window_bounds = array<i64: 1, 32>}, {transform_indices = @transform_3, window_bounds = array<i64: 16, 32>}, {transform_indices = @transform_4, window_bounds = array<i64: 16, 32>}]} {
    %c0_i32 = arith.constant 0 : i32
    %0 = arith.cmpi eq, %arg2, %c0_i32 : i32
    %1 = arith.extui %0 : i1 to i32
    %c0_i32_0 = arith.constant 0 : i32
    %2 = arith.cmpi ne, %1, %c0_i32_0 : i32
    scf.if %2 {
      %cst_10 = arith.constant 0.000000e+00 : f32
      %12 = vector.broadcast %cst_10 : f32 to vector<16x32xf32>
      %c0_11 = arith.constant 0 : index
      %c0_12 = arith.constant 0 : index
      %13 = vector.load %arg8[%c0_11, %c0_12] : memref<16x32xf32, #tpu.memory_space<vmem>>, vector<16x32xf32>
      tpu.vector_store %arg8[%c0_11, %c0_12], %12 {strides = array<i32>} : memref<16x32xf32, #tpu.memory_space<vmem>>, vector<16x32xf32>,
    } else {
    }
    %c0 = arith.constant 0 : index
    %c0_1 = arith.constant 0 : index
    %3 = vector.load %arg8[%c0, %c0_1] : memref<16x32xf32, #tpu.memory_space<vmem>>, vector<16x32xf32>
    %c0_2 = arith.constant 0 : index
    %c0_3 = arith.constant 0 : index
    %4 = vector.load %arg3[%c0_2, %c0_3] : memref<16x32xbf16, #tpu.memory_space<vmem>>, vector<16x32xbf16>
    %c0_4 = arith.constant 0 : index
    %c0_5 = arith.constant 0 : index
    %5 = vector.load %arg4[%c0_4, %c0_5] : memref<32x32xbf16, #tpu.memory_space<vmem>>, vector<32x32xbf16>
    %cst = arith.constant dense<0.000000e+00> : vector<16x32xf32>
    %6 = tpu.matmul %4, %5, %cst {dimension_numbers = #tpu.dot_dimension_numbers<[1], [0], [0], [1], [0, 0, 1, 1], [], []>} : vector<16x32xbf16>, vector<32x32xbf16>, vector<16x32xf32> -> vector<16x32xf32>
    %7 = arith.addf %3, %6 : vector<16x32xf32>
    %c0_6 = arith.constant 0 : index
    %c0_7 = arith.constant 0 : index
    %8 = vector.load %arg8[%c0_6, %c0_7] : memref<16x32xf32, #tpu.memory_space<vmem>>, vector<16x32xf32>
    tpu.vector_store %arg8[%c0_6, %c0_7], %7 {strides = array<i32>} : memref<16x32xf32, #tpu.memory_space<vmem>>, vector<16x32xf32>,
    %c0_i32_8 = arith.constant 0 : i32
    %9 = arith.cmpi eq, %arg2, %c0_i32_8 : i32
    %10 = arith.extui %9 : i1 to i32
    %c0_i32_9 = arith.constant 0 : i32
    %11 = arith.cmpi ne, %10, %c0_i32_9 : i32
    scf.if %11 {
      %c0_10 = arith.constant 0 : index
      %c0_11 = arith.constant 0 : index
      %12 = vector.load %arg8[%c0_10, %c0_11] : memref<16x32xf32, #tpu.memory_space<vmem>>, vector<16x32xf32>
      %c0_12 = arith.constant 0 : index
      %c0_13 = arith.constant 0 : index
      %13 = vector.load %arg5[%c0_12, %c0_13] : memref<1x32xf32, #tpu.memory_space<vmem>>, vector<1x32xf32>
      %14 = vector.broadcast %13 : vector<1x32xf32> to vector<16x32xf32>
      %15 = arith.addf %12, %14 : vector<16x32xf32>
      %c0_14 = arith.constant 0 : index
      %c0_15 = arith.constant 0 : index
      %16 = vector.load %arg6[%c0_14, %c0_15] : memref<16x32xf32, #tpu.memory_space<vmem>>, vector<16x32xf32>
      %17 = arith.addf %15, %16 : vector<16x32xf32>
      %c0_16 = arith.constant 0 : index
      %c0_17 = arith.constant 0 : index
      %18 = vector.load %arg7[%c0_16, %c0_17] : memref<16x32xf32, #tpu.memory_space<vmem>>, vector<16x32xf32>
      tpu.vector_store %arg7[%c0_16, %c0_17], %17 {strides = array<i32>} : memref<16x32xf32, #tpu.memory_space<vmem>>, vector<16x32xf32>,
    } else {
    }
    return
  }
  func.func @transform_0(%arg0: i32, %arg1: i32, %arg2: i32) -> (i32, i32) {
    %c0_i32 = arith.constant 0 : i32
    return %arg0, %arg2 : i32, i32
  }
  func.func @transform_1(%arg0: i32, %arg1: i32, %arg2: i32) -> (i32, i32) {
    %c0_i32 = arith.constant 0 : i32
    return %arg2, %arg1 : i32, i32
  }
  func.func @transform_2(%arg0: i32, %arg1: i32, %arg2: i32) -> (i32, i32) {
    %c0_i32 = arith.constant 0 : i32
    %c0_i32_0 = arith.constant 0 : i32
    return %c0_i32, %arg1 : i32, i32
  }
  func.func @transform_3(%arg0: i32, %arg1: i32, %arg2: i32) -> (i32, i32) {
    %c0_i32 = arith.constant 0 : i32
    return %arg0, %arg1 : i32, i32
  }
  func.func @transform_4(%arg0: i32, %arg1: i32, %arg2: i32) -> (i32, i32) {
    %c0_i32 = arith.constant 0 : i32
    return %arg0, %arg1 : i32, i32
  }
}

module attributes {stable_mosaic.version = 11 : i64} {
  func.func @attn_kernel(%arg0: i32, %arg1: i32, %arg2: i32, %arg3: memref<8x32xbf16, #tpu.memory_space<vmem>>, %arg4: memref<8x32xbf16, #tpu.memory_space<vmem>>, %arg5: memref<8x32xbf16, #tpu.memory_space<vmem>>, %arg6: memref<1x1x8xf32, #tpu.memory_space<vmem>>, %arg7: memref<8x32xbf16, #tpu.memory_space<vmem>>, %arg8: memref<8x4xf32, #tpu.memory_space<vmem>>, %arg9: memref<8x4xf32, #tpu.memory_space<vmem>>, %arg10: memref<8x32xf32, #tpu.memory_space<vmem>>) attributes {dimension_semantics = [#tpu.dimension_semantics<parallel>, #tpu.dimension_semantics<parallel>, #tpu.dimension_semantics<arbitrary>], iteration_bounds = array<i64: 2, 1, 1>, scalar_prefetch = 0 : i64, scratch_operands = 3 : i64, tpu.core_type = #tpu.core_type<tc>, window_params = [{transform_indices = @transform_0, window_bounds = array<i64: 8, 32>}, {transform_indices = @transform_1, window_bounds = array<i64: 8, 32>}, {transform_indices = @transform_2, window_bounds = array<i64: 8, 32>}, {transform_indices = @transform_3, window_bounds = array<i64: 1, 1, 8>}, {transform_indices = @transform_4, window_bounds = array<i64: 8, 32>}]} {
    %c0_i32 = arith.constant 0 : i32
    %0 = arith.cmpi eq, %arg2, %c0_i32 : i32
    %1 = arith.extui %0 : i1 to i32
    %c0_i32_0 = arith.constant 0 : i32
    %2 = arith.cmpi ne, %1, %c0_i32_0 : i32
    scf.if %2 {
      %cst_90 = arith.constant 0xFF800000 : f32
      %132 = vector.broadcast %cst_90 : f32 to vector<8x4xf32>
      %c0_91 = arith.constant 0 : index
      %c0_92 = arith.constant 0 : index
      %133 = vector.load %arg8[%c0_91, %c0_92] : memref<8x4xf32, #tpu.memory_space<vmem>>, vector<8x4xf32>
      tpu.vector_store %arg8[%c0_91, %c0_92], %132 {strides = array<i32>} : memref<8x4xf32, #tpu.memory_space<vmem>>, vector<8x4xf32>,
      %cst_93 = arith.constant 0.000000e+00 : f32
      %134 = vector.broadcast %cst_93 : f32 to vector<8x4xf32>
      %c0_94 = arith.constant 0 : index
      %c0_95 = arith.constant 0 : index
      %135 = vector.load %arg9[%c0_94, %c0_95] : memref<8x4xf32, #tpu.memory_space<vmem>>, vector<8x4xf32>
      tpu.vector_store %arg9[%c0_94, %c0_95], %134 {strides = array<i32>} : memref<8x4xf32, #tpu.memory_space<vmem>>, vector<8x4xf32>,
      %cst_96 = arith.constant 0.000000e+00 : f32
      %136 = vector.broadcast %cst_96 : f32 to vector<8x32xf32>
      %c0_97 = arith.constant 0 : index
      %c0_98 = arith.constant 0 : index
      %137 = vector.load %arg10[%c0_97, %c0_98] : memref<8x32xf32, #tpu.memory_space<vmem>>, vector<8x32xf32>
      tpu.vector_store %arg10[%c0_97, %c0_98], %136 {strides = array<i32>} : memref<8x32xf32, #tpu.memory_space<vmem>>, vector<8x32xf32>,
    } else {
    }
    %c0 = arith.constant 0 : index
    %c0_1 = arith.constant 0 : index
    %c0_2 = arith.constant 0 : index
    %3 = vector.load %arg6[%c0, %c0_1, %c0_2] : memref<1x1x8xf32, #tpu.memory_space<vmem>>, vector<1x1x8xf32>
    %4 = vector.shape_cast %3 : vector<1x1x8xf32> to vector<1x8xf32>
    %c0_3 = arith.constant 0 : index
    %c0_4 = arith.constant 0 : index
    %5 = vector.load %arg3[%c0_3, %c0_4] : memref<8x32xbf16, #tpu.memory_space<vmem>>, vector<8x8xbf16>
    %c0_5 = arith.constant 0 : index
    %c0_6 = arith.constant 0 : index
    %6 = vector.load %arg4[%c0_5, %c0_6] : memref<8x32xbf16, #tpu.memory_space<vmem>>, vector<8x8xbf16>
    %c0_7 = arith.constant 0 : index
    %c0_8 = arith.constant 0 : index
    %7 = vector.load %arg5[%c0_7, %c0_8] : memref<8x32xbf16, #tpu.memory_space<vmem>>, vector<8x8xbf16>
    %cst = arith.constant dense<0.000000e+00> : vector<8x8xf32>
    %8 = tpu.matmul %5, %6, %cst {dimension_numbers = #tpu.dot_dimension_numbers<[1], [1], [0], [0], [0, 0, 1, 0], [], []>} : vector<8x8xbf16>, vector<8x8xbf16>, vector<8x8xf32> -> vector<8x8xf32>
    %cst_9 = arith.constant 0.353553385 : f32
    %9 = vector.broadcast %cst_9 : f32 to vector<8x8xf32>
    %10 = arith.mulf %8, %9 : vector<8x8xf32>
    %11 = vector.broadcast %4 : vector<1x8xf32> to vector<8x8xf32>
    %12 = arith.addf %10, %11 : vector<8x8xf32>
    %c0_10 = arith.constant 0 : index
    %c0_11 = arith.constant 0 : index
    %13 = vector.load %arg8[%c0_10, %c0_11] : memref<8x4xf32, #tpu.memory_space<vmem>>, vector<8x1xf32>
    %cst_12 = arith.constant dense<0xFF800000> : vector<8xf32>
    %14 = vector.multi_reduction <maximumf>, %12, %cst_12 [1] : vector<8x8xf32> to vector<8xf32>
    %15 = vector.shape_cast %14 : vector<8xf32> to vector<8x1xf32>
    %16 = arith.maximumf %13, %15 : vector<8x1xf32>
    %17 = arith.subf %13, %16 : vector<8x1xf32>
    %18 = math.exp %17 : vector<8x1xf32>
    %19 = vector.broadcast %16 : vector<8x1xf32> to vector<8x8xf32>
    %20 = arith.subf %12, %19 : vector<8x8xf32>
    %21 = math.exp %20 : vector<8x8xf32>
    %c0_13 = arith.constant 0 : index
    %c0_14 = arith.constant 0 : index
    %22 = vector.load %arg9[%c0_13, %c0_14] : memref<8x4xf32, #tpu.memory_space<vmem>>, vector<8x1xf32>
    %23 = arith.mulf %18, %22 : vector<8x1xf32>
    %cst_15 = arith.constant dense<0.000000e+00> : vector<8xf32>
    %24 = vector.multi_reduction <add>, %21, %cst_15 [1] : vector<8x8xf32> to vector<8xf32>
    %25 = vector.shape_cast %24 : vector<8xf32> to vector<8x1xf32>
    %26 = arith.addf %23, %25 : vector<8x1xf32>
    %c0_16 = arith.constant 0 : index
    %c0_17 = arith.constant 0 : index
    %27 = vector.load %arg9[%c0_16, %c0_17] : memref<8x4xf32, #tpu.memory_space<vmem>>, vector<8x1xf32>
    tpu.vector_store %arg9[%c0_16, %c0_17], %26 {strides = array<i32>} : memref<8x4xf32, #tpu.memory_space<vmem>>, vector<8x1xf32>,
    %c0_18 = arith.constant 0 : index
    %c0_19 = arith.constant 0 : index
    %28 = vector.load %arg10[%c0_18, %c0_19] : memref<8x32xf32, #tpu.memory_space<vmem>>, vector<8x8xf32>
    %29 = vector.broadcast %18 : vector<8x1xf32> to vector<8x8xf32>
    %30 = arith.mulf %29, %28 : vector<8x8xf32>
    %31 = arith.truncf %21 : vector<8x8xf32> to vector<8x8xbf16>
    %cst_20 = arith.constant dense<0.000000e+00> : vector<8x8xf32>
    %32 = tpu.matmul %31, %7, %cst_20 {dimension_numbers = #tpu.dot_dimension_numbers<[1], [0], [0], [1], [0, 0, 1, 1], [], []>} : vector<8x8xbf16>, vector<8x8xbf16>, vector<8x8xf32> -> vector<8x8xf32>
    %33 = arith.addf %30, %32 : vector<8x8xf32>
    %c0_21 = arith.constant 0 : index
    %c0_22 = arith.constant 0 : index
    %34 = vector.load %arg10[%c0_21, %c0_22] : memref<8x32xf32, #tpu.memory_space<vmem>>, vector<8x8xf32>
    tpu.vector_store %arg10[%c0_21, %c0_22], %33 {strides = array<i32>} : memref<8x32xf32, #tpu.memory_space<vmem>>, vector<8x8xf32>,
    %c0_23 = arith.constant 0 : index
    %c0_24 = arith.constant 0 : index
    %35 = vector.load %arg8[%c0_23, %c0_24] : memref<8x4xf32, #tpu.memory_space<vmem>>, vector<8x1xf32>
    tpu.vector_store %arg8[%c0_23, %c0_24], %16 {strides = array<i32>} : memref<8x4xf32, #tpu.memory_space<vmem>>, vector<8x1xf32>,
    %c0_25 = arith.constant 0 : index
    %c8 = arith.constant 8 : index
    %36 = vector.load %arg3[%c0_25, %c8] : memref<8x32xbf16, #tpu.memory_space<vmem>>, vector<8x8xbf16>
    %c0_26 = arith.constant 0 : index
    %c8_27 = arith.constant 8 : index
    %37 = vector.load %arg4[%c0_26, %c8_27] : memref<8x32xbf16, #tpu.memory_space<vmem>>, vector<8x8xbf16>
    %c0_28 = arith.constant 0 : index
    %c8_29 = arith.constant 8 : index
    %38 = vector.load %arg5[%c0_28, %c8_29] : memref<8x32xbf16, #tpu.memory_space<vmem>>, vector<8x8xbf16>
    %cst_30 = arith.constant dense<0.000000e+00> : vector<8x8xf32>
    %39 = tpu.matmul %36, %37, %cst_30 {dimension_numbers = #tpu.dot_dimension_numbers<[1], [1], [0], [0], [0, 0, 1, 0], [], []>} : vector<8x8xbf16>, vector<8x8xbf16>, vector<8x8xf32> -> vector<8x8xf32>
    %cst_31 = arith.constant 0.353553385 : f32
    %40 = vector.broadcast %cst_31 : f32 to vector<8x8xf32>
    %41 = arith.mulf %39, %40 : vector<8x8xf32>
    %42 = vector.broadcast %4 : vector<1x8xf32> to vector<8x8xf32>
    %43 = arith.addf %41, %42 : vector<8x8xf32>
    %c0_32 = arith.constant 0 : index
    %c1 = arith.constant 1 : index
    %44 = vector.load %arg8[%c0_32, %c1] : memref<8x4xf32, #tpu.memory_space<vmem>>, vector<8x1xf32>
    %cst_33 = arith.constant dense<0xFF800000> : vector<8xf32>
    %45 = vector.multi_reduction <maximumf>, %43, %cst_33 [1] : vector<8x8xf32> to vector<8xf32>
    %46 = vector.shape_cast %45 : vector<8xf32> to vector<8x1xf32>
    %47 = arith.maximumf %44, %46 : vector<8x1xf32>
    %48 = arith.subf %44, %47 : vector<8x1xf32>
    %49 = math.exp %48 : vector<8x1xf32>
    %50 = vector.broadcast %47 : vector<8x1xf32> to vector<8x8xf32>
    %51 = arith.subf %43, %50 : vector<8x8xf32>
    %52 = math.exp %51 : vector<8x8xf32>
    %c0_34 = arith.constant 0 : index
    %c1_35 = arith.constant 1 : index
    %53 = vector.load %arg9[%c0_34, %c1_35] : memref<8x4xf32, #tpu.memory_space<vmem>>, vector<8x1xf32>
    %54 = arith.mulf %49, %53 : vector<8x1xf32>
    %cst_36 = arith.constant dense<0.000000e+00> : vector<8xf32>
    %55 = vector.multi_reduction <add>, %52, %cst_36 [1] : vector<8x8xf32> to vector<8xf32>
    %56 = vector.shape_cast %55 : vector<8xf32> to vector<8x1xf32>
    %57 = arith.addf %54, %56 : vector<8x1xf32>
    %c0_37 = arith.constant 0 : index
    %c1_38 = arith.constant 1 : index
    %58 = vector.load %arg9[%c0_37, %c1_38] : memref<8x4xf32, #tpu.memory_space<vmem>>, vector<8x1xf32>
    tpu.vector_store %arg9[%c0_37, %c1_38], %57 {strides = array<i32>} : memref<8x4xf32, #tpu.memory_space<vmem>>, vector<8x1xf32>,
    %c0_39 = arith.constant 0 : index
    %c8_40 = arith.constant 8 : index
    %59 = vector.load %arg10[%c0_39, %c8_40] : memref<8x32xf32, #tpu.memory_space<vmem>>, vector<8x8xf32>
    %60 = vector.broadcast %49 : vector<8x1xf32> to vector<8x8xf32>
    %61 = arith.mulf %60, %59 : vector<8x8xf32>
    %62 = arith.truncf %52 : vector<8x8xf32> to vector<8x8xbf16>
    %cst_41 = arith.constant dense<0.000000e+00> : vector<8x8xf32>
    %63 = tpu.matmul %62, %38, %cst_41 {dimension_numbers = #tpu.dot_dimension_numbers<[1], [0], [0], [1], [0, 0, 1, 1], [], []>} : vector<8x8xbf16>, vector<8x8xbf16>, vector<8x8xf32> -> vector<8x8xf32>
    %64 = arith.addf %61, %63 : vector<8x8xf32>
    %c0_42 = arith.constant 0 : index
    %c8_43 = arith.constant 8 : index
    %65 = vector.load %arg10[%c0_42, %c8_43] : memref<8x32xf32, #tpu.memory_space<vmem>>, vector<8x8xf32>
    tpu.vector_store %arg10[%c0_42, %c8_43], %64 {strides = array<i32>} : memref<8x32xf32, #tpu.memory_space<vmem>>, vector<8x8xf32>,
    %c0_44 = arith.constant 0 : index
    %c1_45 = arith.constant 1 : index
    %66 = vector.load %arg8[%c0_44, %c1_45] : memref<8x4xf32, #tpu.memory_space<vmem>>, vector<8x1xf32>
    tpu.vector_store %arg8[%c0_44, %c1_45], %47 {strides = array<i32>} : memref<8x4xf32, #tpu.memory_space<vmem>>, vector<8x1xf32>,
    %c0_46 = arith.constant 0 : index
    %c16 = arith.constant 16 : index
    %67 = vector.load %arg3[%c0_46, %c16] : memref<8x32xbf16, #tpu.memory_space<vmem>>, vector<8x8xbf16>
    %c0_47 = arith.constant 0 : index
    %c16_48 = arith.constant 16 : index
    %68 = vector.load %arg4[%c0_47, %c16_48] : memref<8x32xbf16, #tpu.memory_space<vmem>>, vector<8x8xbf16>
    %c0_49 = arith.constant 0 : index
    %c16_50 = arith.constant 16 : index
    %69 = vector.load %arg5[%c0_49, %c16_50] : memref<8x32xbf16, #tpu.memory_space<vmem>>, vector<8x8xbf16>
    %cst_51 = arith.constant dense<0.000000e+00> : vector<8x8xf32>
    %70 = tpu.matmul %67, %68, %cst_51 {dimension_numbers = #tpu.dot_dimension_numbers<[1], [1], [0], [0], [0, 0, 1, 0], [], []>} : vector<8x8xbf16>, vector<8x8xbf16>, vector<8x8xf32> -> vector<8x8xf32>
    %cst_52 = arith.constant 0.353553385 : f32
    %71 = vector.broadcast %cst_52 : f32 to vector<8x8xf32>
    %72 = arith.mulf %70, %71 : vector<8x8xf32>
    %73 = vector.broadcast %4 : vector<1x8xf32> to vector<8x8xf32>
    %74 = arith.addf %72, %73 : vector<8x8xf32>
    %c0_53 = arith.constant 0 : index
    %c2 = arith.constant 2 : index
    %75 = vector.load %arg8[%c0_53, %c2] : memref<8x4xf32, #tpu.memory_space<vmem>>, vector<8x1xf32>
    %cst_54 = arith.constant dense<0xFF800000> : vector<8xf32>
    %76 = vector.multi_reduction <maximumf>, %74, %cst_54 [1] : vector<8x8xf32> to vector<8xf32>
    %77 = vector.shape_cast %76 : vector<8xf32> to vector<8x1xf32>
    %78 = arith.maximumf %75, %77 : vector<8x1xf32>
    %79 = arith.subf %75, %78 : vector<8x1xf32>
    %80 = math.exp %79 : vector<8x1xf32>
    %81 = vector.broadcast %78 : vector<8x1xf32> to vector<8x8xf32>
    %82 = arith.subf %74, %81 : vector<8x8xf32>
    %83 = math.exp %82 : vector<8x8xf32>
    %c0_55 = arith.constant 0 : index
    %c2_56 = arith.constant 2 : index
    %84 = vector.load %arg9[%c0_55, %c2_56] : memref<8x4xf32, #tpu.memory_space<vmem>>, vector<8x1xf32>
    %85 = arith.mulf %80, %84 : vector<8x1xf32>
    %cst_57 = arith.constant dense<0.000000e+00> : vector<8xf32>
    %86 = vector.multi_reduction <add>, %83, %cst_57 [1] : vector<8x8xf32> to vector<8xf32>
    %87 = vector.shape_cast %86 : vector<8xf32> to vector<8x1xf32>
    %88 = arith.addf %85, %87 : vector<8x1xf32>
    %c0_58 = arith.constant 0 : index
    %c2_59 = arith.constant 2 : index
    %89 = vector.load %arg9[%c0_58, %c2_59] : memref<8x4xf32, #tpu.memory_space<vmem>>, vector<8x1xf32>
    tpu.vector_store %arg9[%c0_58, %c2_59], %88 {strides = array<i32>} : memref<8x4xf32, #tpu.memory_space<vmem>>, vector<8x1xf32>,
    %c0_60 = arith.constant 0 : index
    %c16_61 = arith.constant 16 : index
    %90 = vector.load %arg10[%c0_60, %c16_61] : memref<8x32xf32, #tpu.memory_space<vmem>>, vector<8x8xf32>
    %91 = vector.broadcast %80 : vector<8x1xf32> to vector<8x8xf32>
    %92 = arith.mulf %91, %90 : vector<8x8xf32>
    %93 = arith.truncf %83 : vector<8x8xf32> to vector<8x8xbf16>
    %cst_62 = arith.constant dense<0.000000e+00> : vector<8x8xf32>
    %94 = tpu.matmul %93, %69, %cst_62 {dimension_numbers = #tpu.dot_dimension_numbers<[1], [0], [0], [1], [0, 0, 1, 1], [], []>} : vector<8x8xbf16>, vector<8x8xbf16>, vector<8x8xf32> -> vector<8x8xf32>
    %95 = arith.addf %92, %94 : vector<8x8xf32>
    %c0_63 = arith.constant 0 : index
    %c16_64 = arith.constant 16 : index
    %96 = vector.load %arg10[%c0_63, %c16_64] : memref<8x32xf32, #tpu.memory_space<vmem>>, vector<8x8xf32>
    tpu.vector_store %arg10[%c0_63, %c16_64], %95 {strides = array<i32>} : memref<8x32xf32, #tpu.memory_space<vmem>>, vector<8x8xf32>,
    %c0_65 = arith.constant 0 : index
    %c2_66 = arith.constant 2 : index
    %97 = vector.load %arg8[%c0_65, %c2_66] : memref<8x4xf32, #tpu.memory_space<vmem>>, vector<8x1xf32>
    tpu.vector_store %arg8[%c0_65, %c2_66], %78 {strides = array<i32>} : memref<8x4xf32, #tpu.memory_space<vmem>>, vector<8x1xf32>,
    %c0_67 = arith.constant 0 : index
    %c24 = arith.constant 24 : index
    %98 = vector.load %arg3[%c0_67, %c24] : memref<8x32xbf16, #tpu.memory_space<vmem>>, vector<8x8xbf16>
    %c0_68 = arith.constant 0 : index
    %c24_69 = arith.constant 24 : index
    %99 = vector.load %arg4[%c0_68, %c24_69] : memref<8x32xbf16, #tpu.memory_space<vmem>>, vector<8x8xbf16>
    %c0_70 = arith.constant 0 : index
    %c24_71 = arith.constant 24 : index
    %100 = vector.load %arg5[%c0_70, %c24_71] : memref<8x32xbf16, #tpu.memory_space<vmem>>, vector<8x8xbf16>
    %cst_72 = arith.constant dense<0.000000e+00> : vector<8x8xf32>
    %101 = tpu.matmul %98, %99, %cst_72 {dimension_numbers = #tpu.dot_dimension_numbers<[1], [1], [0], [0], [0, 0, 1, 0], [], []>} : vector<8x8xbf16>, vector<8x8xbf16>, vector<8x8xf32> -> vector<8x8xf32>
    %cst_73 = arith.constant 0.353553385 : f32
    %102 = vector.broadcast %cst_73 : f32 to vector<8x8xf32>
    %103 = arith.mulf %101, %102 : vector<8x8xf32>
    %104 = vector.broadcast %4 : vector<1x8xf32> to vector<8x8xf32>
    %105 = arith.addf %103, %104 : vector<8x8xf32>
    %c0_74 = arith.constant 0 : index
    %c3 = arith.constant 3 : index
    %106 = vector.load %arg8[%c0_74, %c3] : memref<8x4xf32, #tpu.memory_space<vmem>>, vector<8x1xf32>
    %cst_75 = arith.constant dense<0xFF800000> : vector<8xf32>
    %107 = vector.multi_reduction <maximumf>, %105, %cst_75 [1] : vector<8x8xf32> to vector<8xf32>
    %108 = vector.shape_cast %107 : vector<8xf32> to vector<8x1xf32>
    %109 = arith.maximumf %106, %108 : vector<8x1xf32>
    %110 = arith.subf %106, %109 : vector<8x1xf32>
    %111 = math.exp %110 : vector<8x1xf32>
    %112 = vector.broadcast %109 : vector<8x1xf32> to vector<8x8xf32>
    %113 = arith.subf %105, %112 : vector<8x8xf32>
    %114 = math.exp %113 : vector<8x8xf32>
    %c0_76 = arith.constant 0 : index
    %c3_77 = arith.constant 3 : index
    %115 = vector.load %arg9[%c0_76, %c3_77] : memref<8x4xf32, #tpu.memory_space<vmem>>, vector<8x1xf32>
    %116 = arith.mulf %111, %115 : vector<8x1xf32>
    %cst_78 = arith.constant dense<0.000000e+00> : vector<8xf32>
    %117 = vector.multi_reduction <add>, %114, %cst_78 [1] : vector<8x8xf32> to vector<8xf32>
    %118 = vector.shape_cast %117 : vector<8xf32> to vector<8x1xf32>
    %119 = arith.addf %116, %118 : vector<8x1xf32>
    %c0_79 = arith.constant 0 : index
    %c3_80 = arith.constant 3 : index
    %120 = vector.load %arg9[%c0_79, %c3_80] : memref<8x4xf32, #tpu.memory_space<vmem>>, vector<8x1xf32>
    tpu.vector_store %arg9[%c0_79, %c3_80], %119 {strides = array<i32>} : memref<8x4xf32, #tpu.memory_space<vmem>>, vector<8x1xf32>,
    %c0_81 = arith.constant 0 : index
    %c24_82 = arith.constant 24 : index
    %121 = vector.load %arg10[%c0_81, %c24_82] : memref<8x32xf32, #tpu.memory_space<vmem>>, vector<8x8xf32>
    %122 = vector.broadcast %111 : vector<8x1xf32> to vector<8x8xf32>
    %123 = arith.mulf %122, %121 : vector<8x8xf32>
    %124 = arith.truncf %114 : vector<8x8xf32> to vector<8x8xbf16>
    %cst_83 = arith.constant dense<0.000000e+00> : vector<8x8xf32>
    %125 = tpu.matmul %124, %100, %cst_83 {dimension_numbers = #tpu.dot_dimension_numbers<[1], [0], [0], [1], [0, 0, 1, 1], [], []>} : vector<8x8xbf16>, vector<8x8xbf16>, vector<8x8xf32> -> vector<8x8xf32>
    %126 = arith.addf %123, %125 : vector<8x8xf32>
    %c0_84 = arith.constant 0 : index
    %c24_85 = arith.constant 24 : index
    %127 = vector.load %arg10[%c0_84, %c24_85] : memref<8x32xf32, #tpu.memory_space<vmem>>, vector<8x8xf32>
    tpu.vector_store %arg10[%c0_84, %c24_85], %126 {strides = array<i32>} : memref<8x32xf32, #tpu.memory_space<vmem>>, vector<8x8xf32>,
    %c0_86 = arith.constant 0 : index
    %c3_87 = arith.constant 3 : index
    %128 = vector.load %arg8[%c0_86, %c3_87] : memref<8x4xf32, #tpu.memory_space<vmem>>, vector<8x1xf32>
    tpu.vector_store %arg8[%c0_86, %c3_87], %109 {strides = array<i32>} : memref<8x4xf32, #tpu.memory_space<vmem>>, vector<8x1xf32>,
    %c0_i32_88 = arith.constant 0 : i32
    %129 = arith.cmpi eq, %arg2, %c0_i32_88 : i32
    %130 = arith.extui %129 : i1 to i32
    %c0_i32_89 = arith.constant 0 : i32
    %131 = arith.cmpi ne, %130, %c0_i32_89 : i32
    scf.if %131 {
      %c0_90 = arith.constant 0 : index
      %c0_91 = arith.constant 0 : index
      %132 = vector.load %arg9[%c0_90, %c0_91] : memref<8x4xf32, #tpu.memory_space<vmem>>, vector<8x1xf32>
      %133 = tpu.reciprocal %132 : vector<8x1xf32> -> vector<8x1xf32>
      %c0_92 = arith.constant 0 : index
      %c0_93 = arith.constant 0 : index
      %134 = vector.load %arg10[%c0_92, %c0_93] : memref<8x32xf32, #tpu.memory_space<vmem>>, vector<8x8xf32>
      %135 = vector.broadcast %133 : vector<8x1xf32> to vector<8x8xf32>
      %136 = arith.mulf %134, %135 : vector<8x8xf32>
      %c0_94 = arith.constant 0 : index
      %c1_95 = arith.constant 1 : index
      %137 = vector.load %arg9[%c0_94, %c1_95] : memref<8x4xf32, #tpu.memory_space<vmem>>, vector<8x1xf32>
      %138 = tpu.reciprocal %137 : vector<8x1xf32> -> vector<8x1xf32>
      %c0_96 = arith.constant 0 : index
      %c8_97 = arith.constant 8 : index
      %139 = vector.load %arg10[%c0_96, %c8_97] : memref<8x32xf32, #tpu.memory_space<vmem>>, vector<8x8xf32>
      %140 = vector.broadcast %138 : vector<8x1xf32> to vector<8x8xf32>
      %141 = arith.mulf %139, %140 : vector<8x8xf32>
      %c0_98 = arith.constant 0 : index
      %c2_99 = arith.constant 2 : index
      %142 = vector.load %arg9[%c0_98, %c2_99] : memref<8x4xf32, #tpu.memory_space<vmem>>, vector<8x1xf32>
      %143 = tpu.reciprocal %142 : vector<8x1xf32> -> vector<8x1xf32>
      %c0_100 = arith.constant 0 : index
      %c16_101 = arith.constant 16 : index
      %144 = vector.load %arg10[%c0_100, %c16_101] : memref<8x32xf32, #tpu.memory_space<vmem>>, vector<8x8xf32>
      %145 = vector.broadcast %143 : vector<8x1xf32> to vector<8x8xf32>
      %146 = arith.mulf %144, %145 : vector<8x8xf32>
      %c0_102 = arith.constant 0 : index
      %c3_103 = arith.constant 3 : index
      %147 = vector.load %arg9[%c0_102, %c3_103] : memref<8x4xf32, #tpu.memory_space<vmem>>, vector<8x1xf32>
      %148 = tpu.reciprocal %147 : vector<8x1xf32> -> vector<8x1xf32>
      %c0_104 = arith.constant 0 : index
      %c24_105 = arith.constant 24 : index
      %149 = vector.load %arg10[%c0_104, %c24_105] : memref<8x32xf32, #tpu.memory_space<vmem>>, vector<8x8xf32>
      %150 = vector.broadcast %148 : vector<8x1xf32> to vector<8x8xf32>
      %151 = arith.mulf %149, %150 : vector<8x8xf32>
      %152 = tpu.concatenate %136, %141, %146, %151 in 1 : vector<8x8xf32>, vector<8x8xf32>, vector<8x8xf32>, vector<8x8xf32> -> vector<8x32xf32>
      %153 = arith.truncf %152 : vector<8x32xf32> to vector<8x32xbf16>
      %c0_106 = arith.constant 0 : index
      %c0_107 = arith.constant 0 : index
      %154 = vector.load %arg7[%c0_106, %c0_107] : memref<8x32xbf16, #tpu.memory_space<vmem>>, vector<8x32xbf16>
      tpu.vector_store %arg7[%c0_106, %c0_107], %153 {strides = array<i32>} : memref<8x32xbf16, #tpu.memory_space<vmem>>, vector<8x32xbf16>,
    } else {
    }
    return
  }
  func.func @transform_0(%arg0: i32, %arg1: i32, %arg2: i32) -> (i32, i32) {
    %c1_i32 = arith.constant 1 : i32
    %0 = arith.muli %arg0, %c1_i32 : i32
    %1 = arith.addi %0, %arg1 : i32
    %c0_i32 = arith.constant 0 : i32
    %c0_i32_0 = arith.constant 0 : i32
    return %1, %c0_i32 : i32, i32
  }
  func.func @transform_1(%arg0: i32, %arg1: i32, %arg2: i32) -> (i32, i32) {
    %c1_i32 = arith.constant 1 : i32
    %0 = arith.muli %arg0, %c1_i32 : i32
    %1 = arith.addi %0, %arg2 : i32
    %c0_i32 = arith.constant 0 : i32
    %c0_i32_0 = arith.constant 0 : i32
    return %1, %c0_i32 : i32, i32
  }
  func.func @transform_2(%arg0: i32, %arg1: i32, %arg2: i32) -> (i32, i32) {
    %c1_i32 = arith.constant 1 : i32
    %0 = arith.muli %arg0, %c1_i32 : i32
    %1 = arith.addi %0, %arg2 : i32
    %c0_i32 = arith.constant 0 : i32
    %c0_i32_0 = arith.constant 0 : i32
    return %1, %c0_i32 : i32, i32
  }
  func.func @transform_3(%arg0: i32, %arg1: i32, %arg2: i32) -> (i32, i32, i32) {
    %c0_i32 = arith.constant 0 : i32
    %c0_i32_0 = arith.constant 0 : i32
    return %arg0, %c0_i32, %arg2 : i32, i32, i32
  }
  func.func @transform_4(%arg0: i32, %arg1: i32, %arg2: i32) -> (i32, i32) {
    %c1_i32 = arith.constant 1 : i32
    %0 = arith.muli %arg0, %c1_i32 : i32
    %1 = arith.addi %0, %arg1 : i32
    %c0_i32 = arith.constant 0 : i32
    %c0_i32_0 = arith.constant 0 : i32
    return %1, %c0_i32 : i32, i32
  }
}

module attributes {stable_mosaic.version = 11 : i64} {
  func.func @ln_qkv_kernel(%arg0: i32, %arg1: memref<16x32xf32, #tpu.memory_space<vmem>>, %arg2: memref<1x32xf32, #tpu.memory_space<vmem>>, %arg3: memref<1x32xf32, #tpu.memory_space<vmem>>, %arg4: memref<32x96xbf16, #tpu.memory_space<vmem>>, %arg5: memref<1x96xf32, #tpu.memory_space<vmem>>, %arg6: memref<16x32xbf16, #tpu.memory_space<vmem>>, %arg7: memref<16x32xbf16, #tpu.memory_space<vmem>>, %arg8: memref<16x32xbf16, #tpu.memory_space<vmem>>) attributes {dimension_semantics = [#tpu.dimension_semantics<parallel>], iteration_bounds = array<i64: 1>, scalar_prefetch = 0 : i64, scratch_operands = 0 : i64, tpu.core_type = #tpu.core_type<tc>, window_params = [{transform_indices = @transform_0, window_bounds = array<i64: 16, 32>}, {pipeline_mode = #tpu.pipeline_mode<synchronous>, transform_indices = @transform_1, window_bounds = array<i64: 1, 32>}, {pipeline_mode = #tpu.pipeline_mode<synchronous>, transform_indices = @transform_2, window_bounds = array<i64: 1, 32>}, {pipeline_mode = #tpu.pipeline_mode<synchronous>, transform_indices = @transform_3, window_bounds = array<i64: 32, 96>}, {pipeline_mode = #tpu.pipeline_mode<synchronous>, transform_indices = @transform_4, window_bounds = array<i64: 1, 96>}, {transform_indices = @transform_5, window_bounds = array<i64: 16, 32>}, {transform_indices = @transform_6, window_bounds = array<i64: 16, 32>}, {transform_indices = @transform_7, window_bounds = array<i64: 16, 32>}]} {
    %c0 = arith.constant 0 : index
    %c0_0 = arith.constant 0 : index
    %0 = vector.load %arg1[%c0, %c0_0] : memref<16x32xf32, #tpu.memory_space<vmem>>, vector<16x32xf32>
    %cst = arith.constant dense<0.000000e+00> : vector<16xf32>
    %1 = vector.multi_reduction <add>, %0, %cst [1] : vector<16x32xf32> to vector<16xf32>
    %2 = vector.shape_cast %1 : vector<16xf32> to vector<16x1xf32>
    %cst_1 = arith.constant 3.200000e+01 : f32
    %3 = vector.broadcast %cst_1 : f32 to vector<16x1xf32>
    %4 = arith.divf %2, %3 : vector<16x1xf32>
    %5 = vector.broadcast %4 : vector<16x1xf32> to vector<16x32xf32>
    %6 = arith.subf %0, %5 : vector<16x32xf32>
    %7 = arith.mulf %6, %6 : vector<16x32xf32>
    %cst_2 = arith.constant dense<0.000000e+00> : vector<16xf32>
    %8 = vector.multi_reduction <add>, %7, %cst_2 [1] : vector<16x32xf32> to vector<16xf32>
    %9 = vector.shape_cast %8 : vector<16xf32> to vector<16x1xf32>
    %cst_3 = arith.constant 3.200000e+01 : f32
    %10 = vector.broadcast %cst_3 : f32 to vector<16x1xf32>
    %11 = arith.divf %9, %10 : vector<16x1xf32>
    %12 = vector.broadcast %4 : vector<16x1xf32> to vector<16x32xf32>
    %13 = arith.subf %0, %12 : vector<16x32xf32>
    %cst_4 = arith.constant 9.99999974E-6 : f32
    %14 = vector.broadcast %cst_4 : f32 to vector<16x1xf32>
    %15 = arith.addf %11, %14 : vector<16x1xf32>
    %16 = math.rsqrt %15 : vector<16x1xf32>
    %17 = vector.broadcast %16 : vector<16x1xf32> to vector<16x32xf32>
    %18 = arith.mulf %13, %17 : vector<16x32xf32>
    %c0_5 = arith.constant 0 : index
    %c0_6 = arith.constant 0 : index
    %19 = vector.load %arg2[%c0_5, %c0_6] : memref<1x32xf32, #tpu.memory_space<vmem>>, vector<1x32xf32>
    %20 = vector.broadcast %19 : vector<1x32xf32> to vector<16x32xf32>
    %21 = arith.mulf %18, %20 : vector<16x32xf32>
    %c0_7 = arith.constant 0 : index
    %c0_8 = arith.constant 0 : index
    %22 = vector.load %arg3[%c0_7, %c0_8] : memref<1x32xf32, #tpu.memory_space<vmem>>, vector<1x32xf32>
    %23 = vector.broadcast %22 : vector<1x32xf32> to vector<16x32xf32>
    %24 = arith.addf %21, %23 : vector<16x32xf32>
    %25 = arith.truncf %24 : vector<16x32xf32> to vector<16x32xbf16>
    %c0_9 = arith.constant 0 : index
    %c0_10 = arith.constant 0 : index
    %26 = vector.load %arg4[%c0_9, %c0_10] : memref<32x96xbf16, #tpu.memory_space<vmem>>, vector<32x96xbf16>
    %cst_11 = arith.constant dense<0.000000e+00> : vector<16x96xf32>
    %27 = tpu.matmul %25, %26, %cst_11 {dimension_numbers = #tpu.dot_dimension_numbers<[1], [0], [0], [1], [0, 0, 1, 1], [], []>} : vector<16x32xbf16>, vector<32x96xbf16>, vector<16x96xf32> -> vector<16x96xf32>
    %c0_12 = arith.constant 0 : index
    %c0_13 = arith.constant 0 : index
    %28 = vector.load %arg5[%c0_12, %c0_13] : memref<1x96xf32, #tpu.memory_space<vmem>>, vector<1x96xf32>
    %29 = vector.broadcast %28 : vector<1x96xf32> to vector<16x96xf32>
    %30 = arith.addf %27, %29 : vector<16x96xf32>
    %31 = vector.extract_strided_slice %30 {offsets = [0, 0], sizes = [16, 32], strides = [1, 1]} : vector<16x96xf32> to vector<16x32xf32>
    %32 = arith.truncf %31 : vector<16x32xf32> to vector<16x32xbf16>
    %c0_14 = arith.constant 0 : index
    %c0_15 = arith.constant 0 : index
    %33 = vector.load %arg6[%c0_14, %c0_15] : memref<16x32xbf16, #tpu.memory_space<vmem>>, vector<16x32xbf16>
    tpu.vector_store %arg6[%c0_14, %c0_15], %32 {strides = array<i32>} : memref<16x32xbf16, #tpu.memory_space<vmem>>, vector<16x32xbf16>,
    %34 = vector.extract_strided_slice %30 {offsets = [0, 32], sizes = [16, 32], strides = [1, 1]} : vector<16x96xf32> to vector<16x32xf32>
    %35 = arith.truncf %34 : vector<16x32xf32> to vector<16x32xbf16>
    %c0_16 = arith.constant 0 : index
    %c0_17 = arith.constant 0 : index
    %36 = vector.load %arg7[%c0_16, %c0_17] : memref<16x32xbf16, #tpu.memory_space<vmem>>, vector<16x32xbf16>
    tpu.vector_store %arg7[%c0_16, %c0_17], %35 {strides = array<i32>} : memref<16x32xbf16, #tpu.memory_space<vmem>>, vector<16x32xbf16>,
    %37 = vector.extract_strided_slice %30 {offsets = [0, 64], sizes = [16, 32], strides = [1, 1]} : vector<16x96xf32> to vector<16x32xf32>
    %38 = arith.truncf %37 : vector<16x32xf32> to vector<16x32xbf16>
    %c0_18 = arith.constant 0 : index
    %c0_19 = arith.constant 0 : index
    %39 = vector.load %arg8[%c0_18, %c0_19] : memref<16x32xbf16, #tpu.memory_space<vmem>>, vector<16x32xbf16>
    tpu.vector_store %arg8[%c0_18, %c0_19], %38 {strides = array<i32>} : memref<16x32xbf16, #tpu.memory_space<vmem>>, vector<16x32xbf16>,
    return
  }
  func.func @transform_0(%arg0: i32) -> (i32, i32) {
    %c0_i32 = arith.constant 0 : i32
    %c0_i32_0 = arith.constant 0 : i32
    return %arg0, %c0_i32 : i32, i32
  }
  func.func @transform_1(%arg0: i32) -> (i32, i32) {
    %c0_i32 = arith.constant 0 : i32
    %c0_i32_0 = arith.constant 0 : i32
    %c0_i32_1 = arith.constant 0 : i32
    return %c0_i32, %c0_i32_0 : i32, i32
  }
  func.func @transform_2(%arg0: i32) -> (i32, i32) {
    %c0_i32 = arith.constant 0 : i32
    %c0_i32_0 = arith.constant 0 : i32
    %c0_i32_1 = arith.constant 0 : i32
    return %c0_i32, %c0_i32_0 : i32, i32
  }
  func.func @transform_3(%arg0: i32) -> (i32, i32) {
    %c0_i32 = arith.constant 0 : i32
    %c0_i32_0 = arith.constant 0 : i32
    %c0_i32_1 = arith.constant 0 : i32
    return %c0_i32, %c0_i32_0 : i32, i32
  }
  func.func @transform_4(%arg0: i32) -> (i32, i32) {
    %c0_i32 = arith.constant 0 : i32
    %c0_i32_0 = arith.constant 0 : i32
    %c0_i32_1 = arith.constant 0 : i32
    return %c0_i32, %c0_i32_0 : i32, i32
  }
  func.func @transform_5(%arg0: i32) -> (i32, i32) {
    %c0_i32 = arith.constant 0 : i32
    %c0_i32_0 = arith.constant 0 : i32
    return %arg0, %c0_i32 : i32, i32
  }
  func.func @transform_6(%arg0: i32) -> (i32, i32) {
    %c0_i32 = arith.constant 0 : i32
    %c0_i32_0 = arith.constant 0 : i32
    return %arg0, %c0_i32 : i32, i32
  }
  func.func @transform_7(%arg0: i32) -> (i32, i32) {
    %c0_i32 = arith.constant 0 : i32
    %c0_i32_0 = arith.constant 0 : i32
    return %arg0, %c0_i32 : i32, i32
  }
}

module attributes {stable_mosaic.version = 11 : i64} {
  func.func @ln_ffn_kernel(%arg0: i32, %arg1: i32, %arg2: memref<16x32xf32, #tpu.memory_space<vmem>>, %arg3: memref<1x32xf32, #tpu.memory_space<vmem>>, %arg4: memref<1x32xf32, #tpu.memory_space<vmem>>, %arg5: memref<32x64xbf16, #tpu.memory_space<vmem>>, %arg6: memref<1x64xf32, #tpu.memory_space<vmem>>, %arg7: memref<64x32xbf16, #tpu.memory_space<vmem>>, %arg8: memref<1x32xf32, #tpu.memory_space<vmem>>, %arg9: memref<16x32xf32, #tpu.memory_space<vmem>>, %arg10: memref<16x32xbf16, #tpu.memory_space<vmem>>, %arg11: memref<16x32xf32, #tpu.memory_space<vmem>>) attributes {dimension_semantics = [#tpu.dimension_semantics<parallel>, #tpu.dimension_semantics<arbitrary>], iteration_bounds = array<i64: 1, 1>, scalar_prefetch = 0 : i64, scratch_operands = 2 : i64, tpu.core_type = #tpu.core_type<tc>, window_params = [{transform_indices = @transform_0, window_bounds = array<i64: 16, 32>}, {pipeline_mode = #tpu.pipeline_mode<synchronous>, transform_indices = @transform_1, window_bounds = array<i64: 1, 32>}, {pipeline_mode = #tpu.pipeline_mode<synchronous>, transform_indices = @transform_2, window_bounds = array<i64: 1, 32>}, {transform_indices = @transform_3, window_bounds = array<i64: 32, 64>}, {transform_indices = @transform_4, window_bounds = array<i64: 1, 64>}, {transform_indices = @transform_5, window_bounds = array<i64: 64, 32>}, {pipeline_mode = #tpu.pipeline_mode<synchronous>, transform_indices = @transform_6, window_bounds = array<i64: 1, 32>}, {transform_indices = @transform_7, window_bounds = array<i64: 16, 32>}]} {
    %c0_i32 = arith.constant 0 : i32
    %0 = arith.cmpi eq, %arg1, %c0_i32 : i32
    %1 = arith.extui %0 : i1 to i32
    %c0_i32_0 = arith.constant 0 : i32
    %2 = arith.cmpi ne, %1, %c0_i32_0 : i32
    scf.if %2 {
      %c0_16 = arith.constant 0 : index
      %c0_17 = arith.constant 0 : index
      %20 = vector.load %arg2[%c0_16, %c0_17] : memref<16x32xf32, #tpu.memory_space<vmem>>, vector<16x32xf32>
      %cst_18 = arith.constant dense<0.000000e+00> : vector<16xf32>
      %21 = vector.multi_reduction <add>, %20, %cst_18 [1] : vector<16x32xf32> to vector<16xf32>
      %22 = vector.shape_cast %21 : vector<16xf32> to vector<16x1xf32>
      %cst_19 = arith.constant 3.200000e+01 : f32
      %23 = vector.broadcast %cst_19 : f32 to vector<16x1xf32>
      %24 = arith.divf %22, %23 : vector<16x1xf32>
      %25 = vector.broadcast %24 : vector<16x1xf32> to vector<16x32xf32>
      %26 = arith.subf %20, %25 : vector<16x32xf32>
      %27 = arith.mulf %26, %26 : vector<16x32xf32>
      %cst_20 = arith.constant dense<0.000000e+00> : vector<16xf32>
      %28 = vector.multi_reduction <add>, %27, %cst_20 [1] : vector<16x32xf32> to vector<16xf32>
      %29 = vector.shape_cast %28 : vector<16xf32> to vector<16x1xf32>
      %cst_21 = arith.constant 3.200000e+01 : f32
      %30 = vector.broadcast %cst_21 : f32 to vector<16x1xf32>
      %31 = arith.divf %29, %30 : vector<16x1xf32>
      %32 = vector.broadcast %24 : vector<16x1xf32> to vector<16x32xf32>
      %33 = arith.subf %20, %32 : vector<16x32xf32>
      %cst_22 = arith.constant 9.99999974E-6 : f32
      %34 = vector.broadcast %cst_22 : f32 to vector<16x1xf32>
      %35 = arith.addf %31, %34 : vector<16x1xf32>
      %36 = math.rsqrt %35 : vector<16x1xf32>
      %37 = vector.broadcast %36 : vector<16x1xf32> to vector<16x32xf32>
      %38 = arith.mulf %33, %37 : vector<16x32xf32>
      %c0_23 = arith.constant 0 : index
      %c0_24 = arith.constant 0 : index
      %39 = vector.load %arg3[%c0_23, %c0_24] : memref<1x32xf32, #tpu.memory_space<vmem>>, vector<1x32xf32>
      %40 = vector.broadcast %39 : vector<1x32xf32> to vector<16x32xf32>
      %41 = arith.mulf %38, %40 : vector<16x32xf32>
      %c0_25 = arith.constant 0 : index
      %c0_26 = arith.constant 0 : index
      %42 = vector.load %arg4[%c0_25, %c0_26] : memref<1x32xf32, #tpu.memory_space<vmem>>, vector<1x32xf32>
      %43 = vector.broadcast %42 : vector<1x32xf32> to vector<16x32xf32>
      %44 = arith.addf %41, %43 : vector<16x32xf32>
      %45 = arith.truncf %44 : vector<16x32xf32> to vector<16x32xbf16>
      %c0_27 = arith.constant 0 : index
      %c0_28 = arith.constant 0 : index
      %46 = vector.load %arg10[%c0_27, %c0_28] : memref<16x32xbf16, #tpu.memory_space<vmem>>, vector<16x32xbf16>
      tpu.vector_store %arg10[%c0_27, %c0_28], %45 {strides = array<i32>} : memref<16x32xbf16, #tpu.memory_space<vmem>>, vector<16x32xbf16>,
      %cst_29 = arith.constant 0.000000e+00 : f32
      %47 = vector.broadcast %cst_29 : f32 to vector<16x32xf32>
      %c0_30 = arith.constant 0 : index
      %c0_31 = arith.constant 0 : index
      %48 = vector.load %arg11[%c0_30, %c0_31] : memref<16x32xf32, #tpu.memory_space<vmem>>, vector<16x32xf32>
      tpu.vector_store %arg11[%c0_30, %c0_31], %47 {strides = array<i32>} : memref<16x32xf32, #tpu.memory_space<vmem>>, vector<16x32xf32>,
    } else {
    }
    %c0 = arith.constant 0 : index
    %c0_1 = arith.constant 0 : index
    %3 = vector.load %arg10[%c0, %c0_1] : memref<16x32xbf16, #tpu.memory_space<vmem>>, vector<16x32xbf16>
    %c0_2 = arith.constant 0 : index
    %c0_3 = arith.constant 0 : index
    %4 = vector.load %arg5[%c0_2, %c0_3] : memref<32x64xbf16, #tpu.memory_space<vmem>>, vector<32x64xbf16>
    %cst = arith.constant dense<0.000000e+00> : vector<16x64xf32>
    %5 = tpu.matmul %3, %4, %cst {dimension_numbers = #tpu.dot_dimension_numbers<[1], [0], [0], [1], [0, 0, 1, 1], [], []>} : vector<16x32xbf16>, vector<32x64xbf16>, vector<16x64xf32> -> vector<16x64xf32>
    %c0_4 = arith.constant 0 : index
    %c0_5 = arith.constant 0 : index
    %6 = vector.load %arg6[%c0_4, %c0_5] : memref<1x64xf32, #tpu.memory_space<vmem>>, vector<1x64xf32>
    %7 = vector.broadcast %6 : vector<1x64xf32> to vector<16x64xf32>
    %8 = arith.addf %5, %7 : vector<16x64xf32>
    %cst_6 = arith.constant 0.000000e+00 : f32
    %9 = vector.broadcast %cst_6 : f32 to vector<16x64xf32>
    %10 = arith.maximumf %8, %9 : vector<16x64xf32>
    %c0_7 = arith.constant 0 : index
    %c0_8 = arith.constant 0 : index
    %11 = vector.load %arg11[%c0_7, %c0_8] : memref<16x32xf32, #tpu.memory_space<vmem>>, vector<16x32xf32>
    %12 = arith.truncf %10 : vector<16x64xf32> to vector<16x64xbf16>
    %c0_9 = arith.constant 0 : index
    %c0_10 = arith.constant 0 : index
    %13 = vector.load %arg7[%c0_9, %c0_10] : memref<64x32xbf16, #tpu.memory_space<vmem>>, vector<64x32xbf16>
    %cst_11 = arith.constant dense<0.000000e+00> : vector<16x32xf32>
    %14 = tpu.matmul %12, %13, %cst_11 {dimension_numbers = #tpu.dot_dimension_numbers<[1], [0], [0], [1], [0, 0, 1, 1], [], []>} : vector<16x64xbf16>, vector<64x32xbf16>, vector<16x32xf32> -> vector<16x32xf32>
    %15 = arith.addf %11, %14 : vector<16x32xf32>
    %c0_12 = arith.constant 0 : index
    %c0_13 = arith.constant 0 : index
    %16 = vector.load %arg11[%c0_12, %c0_13] : memref<16x32xf32, #tpu.memory_space<vmem>>, vector<16x32xf32>
    tpu.vector_store %arg11[%c0_12, %c0_13], %15 {strides = array<i32>} : memref<16x32xf32, #tpu.memory_space<vmem>>, vector<16x32xf32>,
    %c0_i32_14 = arith.constant 0 : i32
    %17 = arith.cmpi eq, %arg1, %c0_i32_14 : i32
    %18 = arith.extui %17 : i1 to i32
    %c0_i32_15 = arith.constant 0 : i32
    %19 = arith.cmpi ne, %18, %c0_i32_15 : i32
    scf.if %19 {
      %c0_16 = arith.constant 0 : index
      %c0_17 = arith.constant 0 : index
      %20 = vector.load %arg2[%c0_16, %c0_17] : memref<16x32xf32, #tpu.memory_space<vmem>>, vector<16x32xf32>
      %c0_18 = arith.constant 0 : index
      %c0_19 = arith.constant 0 : index
      %21 = vector.load %arg11[%c0_18, %c0_19] : memref<16x32xf32, #tpu.memory_space<vmem>>, vector<16x32xf32>
      %22 = arith.addf %20, %21 : vector<16x32xf32>
      %c0_20 = arith.constant 0 : index
      %c0_21 = arith.constant 0 : index
      %23 = vector.load %arg8[%c0_20, %c0_21] : memref<1x32xf32, #tpu.memory_space<vmem>>, vector<1x32xf32>
      %24 = vector.broadcast %23 : vector<1x32xf32> to vector<16x32xf32>
      %25 = arith.addf %22, %24 : vector<16x32xf32>
      %c0_22 = arith.constant 0 : index
      %c0_23 = arith.constant 0 : index
      %26 = vector.load %arg9[%c0_22, %c0_23] : memref<16x32xf32, #tpu.memory_space<vmem>>, vector<16x32xf32>
      tpu.vector_store %arg9[%c0_22, %c0_23], %25 {strides = array<i32>} : memref<16x32xf32, #tpu.memory_space<vmem>>, vector<16x32xf32>,
    } else {
    }
    return
  }
  func.func @transform_0(%arg0: i32, %arg1: i32) -> (i32, i32) {
    %c0_i32 = arith.constant 0 : i32
    %c0_i32_0 = arith.constant 0 : i32
    return %arg0, %c0_i32 : i32, i32
  }
  func.func @transform_1(%arg0: i32, %arg1: i32) -> (i32, i32) {
    %c0_i32 = arith.constant 0 : i32
    %c0_i32_0 = arith.constant 0 : i32
    %c0_i32_1 = arith.constant 0 : i32
    return %c0_i32, %c0_i32_0 : i32, i32
  }
  func.func @transform_2(%arg0: i32, %arg1: i32) -> (i32, i32) {
    %c0_i32 = arith.constant 0 : i32
    %c0_i32_0 = arith.constant 0 : i32
    %c0_i32_1 = arith.constant 0 : i32
    return %c0_i32, %c0_i32_0 : i32, i32
  }
  func.func @transform_3(%arg0: i32, %arg1: i32) -> (i32, i32) {
    %c0_i32 = arith.constant 0 : i32
    %c0_i32_0 = arith.constant 0 : i32
    return %c0_i32, %arg1 : i32, i32
  }
  func.func @transform_4(%arg0: i32, %arg1: i32) -> (i32, i32) {
    %c0_i32 = arith.constant 0 : i32
    %c0_i32_0 = arith.constant 0 : i32
    return %c0_i32, %arg1 : i32, i32
  }
  func.func @transform_5(%arg0: i32, %arg1: i32) -> (i32, i32) {
    %c0_i32 = arith.constant 0 : i32
    %c0_i32_0 = arith.constant 0 : i32
    return %arg1, %c0_i32 : i32, i32
  }
  func.func @transform_6(%arg0: i32, %arg1: i32) -> (i32, i32) {
    %c0_i32 = arith.constant 0 : i32
    %c0_i32_0 = arith.constant 0 : i32
    %c0_i32_1 = arith.constant 0 : i32
    return %c0_i32, %c0_i32_0 : i32, i32
  }
  func.func @transform_7(%arg0: i32, %arg1: i32) -> (i32, i32) {
    %c0_i32 = arith.constant 0 : i32
    %c0_i32_0 = arith.constant 0 : i32
    return %arg0, %c0_i32 : i32, i32
  }
}

module attributes {stable_mosaic.version = 11 : i64} {
  func.func @ln_qkv_kernel(%arg0: i32, %arg1: memref<16x32xf32, #tpu.memory_space<vmem>>, %arg2: memref<1x32xf32, #tpu.memory_space<vmem>>, %arg3: memref<1x32xf32, #tpu.memory_space<vmem>>, %arg4: memref<32x96xbf16, #tpu.memory_space<vmem>>, %arg5: memref<1x96xf32, #tpu.memory_space<vmem>>, %arg6: memref<16x32xbf16, #tpu.memory_space<vmem>>, %arg7: memref<16x32xbf16, #tpu.memory_space<vmem>>, %arg8: memref<16x32xbf16, #tpu.memory_space<vmem>>) attributes {dimension_semantics = [#tpu.dimension_semantics<parallel>], iteration_bounds = array<i64: 1>, scalar_prefetch = 0 : i64, scratch_operands = 0 : i64, tpu.core_type = #tpu.core_type<tc>, window_params = [{transform_indices = @transform_0, window_bounds = array<i64: 16, 32>}, {pipeline_mode = #tpu.pipeline_mode<synchronous>, transform_indices = @transform_1, window_bounds = array<i64: 1, 32>}, {pipeline_mode = #tpu.pipeline_mode<synchronous>, transform_indices = @transform_2, window_bounds = array<i64: 1, 32>}, {pipeline_mode = #tpu.pipeline_mode<synchronous>, transform_indices = @transform_3, window_bounds = array<i64: 32, 96>}, {pipeline_mode = #tpu.pipeline_mode<synchronous>, transform_indices = @transform_4, window_bounds = array<i64: 1, 96>}, {transform_indices = @transform_5, window_bounds = array<i64: 16, 32>}, {transform_indices = @transform_6, window_bounds = array<i64: 16, 32>}, {transform_indices = @transform_7, window_bounds = array<i64: 16, 32>}]} {
    %c0 = arith.constant 0 : index
    %c0_0 = arith.constant 0 : index
    %0 = vector.load %arg1[%c0, %c0_0] : memref<16x32xf32, #tpu.memory_space<vmem>>, vector<16x32xf32>
    %cst = arith.constant dense<0.000000e+00> : vector<16xf32>
    %1 = vector.multi_reduction <add>, %0, %cst [1] : vector<16x32xf32> to vector<16xf32>
    %2 = vector.shape_cast %1 : vector<16xf32> to vector<16x1xf32>
    %cst_1 = arith.constant 3.200000e+01 : f32
    %3 = vector.broadcast %cst_1 : f32 to vector<16x1xf32>
    %4 = arith.divf %2, %3 : vector<16x1xf32>
    %5 = vector.broadcast %4 : vector<16x1xf32> to vector<16x32xf32>
    %6 = arith.subf %0, %5 : vector<16x32xf32>
    %7 = arith.mulf %6, %6 : vector<16x32xf32>
    %cst_2 = arith.constant dense<0.000000e+00> : vector<16xf32>
    %8 = vector.multi_reduction <add>, %7, %cst_2 [1] : vector<16x32xf32> to vector<16xf32>
    %9 = vector.shape_cast %8 : vector<16xf32> to vector<16x1xf32>
    %cst_3 = arith.constant 3.200000e+01 : f32
    %10 = vector.broadcast %cst_3 : f32 to vector<16x1xf32>
    %11 = arith.divf %9, %10 : vector<16x1xf32>
    %12 = vector.broadcast %4 : vector<16x1xf32> to vector<16x32xf32>
    %13 = arith.subf %0, %12 : vector<16x32xf32>
    %cst_4 = arith.constant 9.99999974E-6 : f32
    %14 = vector.broadcast %cst_4 : f32 to vector<16x1xf32>
    %15 = arith.addf %11, %14 : vector<16x1xf32>
    %16 = math.rsqrt %15 : vector<16x1xf32>
    %17 = vector.broadcast %16 : vector<16x1xf32> to vector<16x32xf32>
    %18 = arith.mulf %13, %17 : vector<16x32xf32>
    %c0_5 = arith.constant 0 : index
    %c0_6 = arith.constant 0 : index
    %19 = vector.load %arg2[%c0_5, %c0_6] : memref<1x32xf32, #tpu.memory_space<vmem>>, vector<1x32xf32>
    %20 = vector.broadcast %19 : vector<1x32xf32> to vector<16x32xf32>
    %21 = arith.mulf %18, %20 : vector<16x32xf32>
    %c0_7 = arith.constant 0 : index
    %c0_8 = arith.constant 0 : index
    %22 = vector.load %arg3[%c0_7, %c0_8] : memref<1x32xf32, #tpu.memory_space<vmem>>, vector<1x32xf32>
    %23 = vector.broadcast %22 : vector<1x32xf32> to vector<16x32xf32>
    %24 = arith.addf %21, %23 : vector<16x32xf32>
    %25 = arith.truncf %24 : vector<16x32xf32> to vector<16x32xbf16>
    %c0_9 = arith.constant 0 : index
    %c0_10 = arith.constant 0 : index
    %26 = vector.load %arg4[%c0_9, %c0_10] : memref<32x96xbf16, #tpu.memory_space<vmem>>, vector<32x96xbf16>
    %cst_11 = arith.constant dense<0.000000e+00> : vector<16x96xf32>
    %27 = tpu.matmul %25, %26, %cst_11 {dimension_numbers = #tpu.dot_dimension_numbers<[1], [0], [0], [1], [0, 0, 1, 1], [], []>} : vector<16x32xbf16>, vector<32x96xbf16>, vector<16x96xf32> -> vector<16x96xf32>
    %c0_12 = arith.constant 0 : index
    %c0_13 = arith.constant 0 : index
    %28 = vector.load %arg5[%c0_12, %c0_13] : memref<1x96xf32, #tpu.memory_space<vmem>>, vector<1x96xf32>
    %29 = vector.broadcast %28 : vector<1x96xf32> to vector<16x96xf32>
    %30 = arith.addf %27, %29 : vector<16x96xf32>
    %31 = vector.extract_strided_slice %30 {offsets = [0, 0], sizes = [16, 32], strides = [1, 1]} : vector<16x96xf32> to vector<16x32xf32>
    %32 = arith.truncf %31 : vector<16x32xf32> to vector<16x32xbf16>
    %c0_14 = arith.constant 0 : index
    %c0_15 = arith.constant 0 : index
    %33 = vector.load %arg6[%c0_14, %c0_15] : memref<16x32xbf16, #tpu.memory_space<vmem>>, vector<16x32xbf16>
    tpu.vector_store %arg6[%c0_14, %c0_15], %32 {strides = array<i32>} : memref<16x32xbf16, #tpu.memory_space<vmem>>, vector<16x32xbf16>,
    %34 = vector.extract_strided_slice %30 {offsets = [0, 32], sizes = [16, 32], strides = [1, 1]} : vector<16x96xf32> to vector<16x32xf32>
    %35 = arith.truncf %34 : vector<16x32xf32> to vector<16x32xbf16>
    %c0_16 = arith.constant 0 : index
    %c0_17 = arith.constant 0 : index
    %36 = vector.load %arg7[%c0_16, %c0_17] : memref<16x32xbf16, #tpu.memory_space<vmem>>, vector<16x32xbf16>
    tpu.vector_store %arg7[%c0_16, %c0_17], %35 {strides = array<i32>} : memref<16x32xbf16, #tpu.memory_space<vmem>>, vector<16x32xbf16>,
    %37 = vector.extract_strided_slice %30 {offsets = [0, 64], sizes = [16, 32], strides = [1, 1]} : vector<16x96xf32> to vector<16x32xf32>
    %38 = arith.truncf %37 : vector<16x32xf32> to vector<16x32xbf16>
    %c0_18 = arith.constant 0 : index
    %c0_19 = arith.constant 0 : index
    %39 = vector.load %arg8[%c0_18, %c0_19] : memref<16x32xbf16, #tpu.memory_space<vmem>>, vector<16x32xbf16>
    tpu.vector_store %arg8[%c0_18, %c0_19], %38 {strides = array<i32>} : memref<16x32xbf16, #tpu.memory_space<vmem>>, vector<16x32xbf16>,
    return
  }
  func.func @transform_0(%arg0: i32) -> (i32, i32) {
    %c0_i32 = arith.constant 0 : i32
    %c0_i32_0 = arith.constant 0 : i32
    return %arg0, %c0_i32 : i32, i32
  }
  func.func @transform_1(%arg0: i32) -> (i32, i32) {
    %c0_i32 = arith.constant 0 : i32
    %c0_i32_0 = arith.constant 0 : i32
    %c0_i32_1 = arith.constant 0 : i32
    return %c0_i32, %c0_i32_0 : i32, i32
  }
  func.func @transform_2(%arg0: i32) -> (i32, i32) {
    %c0_i32 = arith.constant 0 : i32
    %c0_i32_0 = arith.constant 0 : i32
    %c0_i32_1 = arith.constant 0 : i32
    return %c0_i32, %c0_i32_0 : i32, i32
  }
  func.func @transform_3(%arg0: i32) -> (i32, i32) {
    %c0_i32 = arith.constant 0 : i32
    %c0_i32_0 = arith.constant 0 : i32
    %c0_i32_1 = arith.constant 0 : i32
    return %c0_i32, %c0_i32_0 : i32, i32
  }
  func.func @transform_4(%arg0: i32) -> (i32, i32) {
    %c0_i32 = arith.constant 0 : i32
    %c0_i32_0 = arith.constant 0 : i32
    %c0_i32_1 = arith.constant 0 : i32
    return %c0_i32, %c0_i32_0 : i32, i32
  }
  func.func @transform_5(%arg0: i32) -> (i32, i32) {
    %c0_i32 = arith.constant 0 : i32
    %c0_i32_0 = arith.constant 0 : i32
    return %arg0, %c0_i32 : i32, i32
  }
  func.func @transform_6(%arg0: i32) -> (i32, i32) {
    %c0_i32 = arith.constant 0 : i32
    %c0_i32_0 = arith.constant 0 : i32
    return %arg0, %c0_i32 : i32, i32
  }
  func.func @transform_7(%arg0: i32) -> (i32, i32) {
    %c0_i32 = arith.constant 0 : i32
    %c0_i32_0 = arith.constant 0 : i32
    return %arg0, %c0_i32 : i32, i32
  }
}

module attributes {stable_mosaic.version = 11 : i64} {
  func.func @layernorm_kernel(%arg0: i32, %arg1: memref<16x32xf32, #tpu.memory_space<vmem>>, %arg2: memref<1x32xf32, #tpu.memory_space<vmem>>, %arg3: memref<1x32xf32, #tpu.memory_space<vmem>>, %arg4: memref<16x32xf32, #tpu.memory_space<vmem>>) attributes {dimension_semantics = [#tpu.dimension_semantics<parallel>], iteration_bounds = array<i64: 1>, scalar_prefetch = 0 : i64, scratch_operands = 0 : i64, tpu.core_type = #tpu.core_type<tc>, window_params = [{transform_indices = @transform_0, window_bounds = array<i64: 16, 32>}, {pipeline_mode = #tpu.pipeline_mode<synchronous>, transform_indices = @transform_1, window_bounds = array<i64: 1, 32>}, {pipeline_mode = #tpu.pipeline_mode<synchronous>, transform_indices = @transform_2, window_bounds = array<i64: 1, 32>}, {transform_indices = @transform_3, window_bounds = array<i64: 16, 32>}]} {
    %c0 = arith.constant 0 : index
    %c0_0 = arith.constant 0 : index
    %0 = vector.load %arg1[%c0, %c0_0] : memref<16x32xf32, #tpu.memory_space<vmem>>, vector<16x32xf32>
    %cst = arith.constant dense<0.000000e+00> : vector<16xf32>
    %1 = vector.multi_reduction <add>, %0, %cst [1] : vector<16x32xf32> to vector<16xf32>
    %2 = vector.shape_cast %1 : vector<16xf32> to vector<16x1xf32>
    %cst_1 = arith.constant 3.200000e+01 : f32
    %3 = vector.broadcast %cst_1 : f32 to vector<16x1xf32>
    %4 = arith.divf %2, %3 : vector<16x1xf32>
    %5 = vector.broadcast %4 : vector<16x1xf32> to vector<16x32xf32>
    %6 = arith.subf %0, %5 : vector<16x32xf32>
    %7 = arith.mulf %6, %6 : vector<16x32xf32>
    %cst_2 = arith.constant dense<0.000000e+00> : vector<16xf32>
    %8 = vector.multi_reduction <add>, %7, %cst_2 [1] : vector<16x32xf32> to vector<16xf32>
    %9 = vector.shape_cast %8 : vector<16xf32> to vector<16x1xf32>
    %cst_3 = arith.constant 3.200000e+01 : f32
    %10 = vector.broadcast %cst_3 : f32 to vector<16x1xf32>
    %11 = arith.divf %9, %10 : vector<16x1xf32>
    %12 = vector.broadcast %4 : vector<16x1xf32> to vector<16x32xf32>
    %13 = arith.subf %0, %12 : vector<16x32xf32>
    %cst_4 = arith.constant 9.99999974E-6 : f32
    %14 = vector.broadcast %cst_4 : f32 to vector<16x1xf32>
    %15 = arith.addf %11, %14 : vector<16x1xf32>
    %16 = math.rsqrt %15 : vector<16x1xf32>
    %17 = vector.broadcast %16 : vector<16x1xf32> to vector<16x32xf32>
    %18 = arith.mulf %13, %17 : vector<16x32xf32>
    %c0_5 = arith.constant 0 : index
    %c0_6 = arith.constant 0 : index
    %19 = vector.load %arg2[%c0_5, %c0_6] : memref<1x32xf32, #tpu.memory_space<vmem>>, vector<1x32xf32>
    %20 = vector.broadcast %19 : vector<1x32xf32> to vector<16x32xf32>
    %21 = arith.mulf %18, %20 : vector<16x32xf32>
    %c0_7 = arith.constant 0 : index
    %c0_8 = arith.constant 0 : index
    %22 = vector.load %arg3[%c0_7, %c0_8] : memref<1x32xf32, #tpu.memory_space<vmem>>, vector<1x32xf32>
    %23 = vector.broadcast %22 : vector<1x32xf32> to vector<16x32xf32>
    %24 = arith.addf %21, %23 : vector<16x32xf32>
    %c0_9 = arith.constant 0 : index
    %c0_10 = arith.constant 0 : index
    %25 = vector.load %arg4[%c0_9, %c0_10] : memref<16x32xf32, #tpu.memory_space<vmem>>, vector<16x32xf32>
    tpu.vector_store %arg4[%c0_9, %c0_10], %24 {strides = array<i32>} : memref<16x32xf32, #tpu.memory_space<vmem>>, vector<16x32xf32>,
    return
  }
  func.func @transform_0(%arg0: i32) -> (i32, i32) {
    %c0_i32 = arith.constant 0 : i32
    %c0_i32_0 = arith.constant 0 : i32
    return %arg0, %c0_i32 : i32, i32
  }
  func.func @transform_1(%arg0: i32) -> (i32, i32) {
    %c0_i32 = arith.constant 0 : i32
    %c0_i32_0 = arith.constant 0 : i32
    %c0_i32_1 = arith.constant 0 : i32
    return %c0_i32, %c0_i32_0 : i32, i32
  }
  func.func @transform_2(%arg0: i32) -> (i32, i32) {
    %c0_i32 = arith.constant 0 : i32
    %c0_i32_0 = arith.constant 0 : i32
    %c0_i32_1 = arith.constant 0 : i32
    return %c0_i32, %c0_i32_0 : i32, i32
  }
  func.func @transform_3(%arg0: i32) -> (i32, i32) {
    %c0_i32 = arith.constant 0 : i32
    %c0_i32_0 = arith.constant 0 : i32
    return %arg0, %c0_i32 : i32, i32
  }
}

</mosaic_0001>

<bundles_post_ra>
// kernel: encoder_forward.11
= control target key start
LH: loop header
LB: loop body
LE: loop exit
PB: predicated region body
PF: predicated region fallthrough
CT: control target
= control target key end

     0   :  { %vm22_vm0 = vcmask 261120   ;;  %v144_v0 = vmov 0.0   ;;  %vm145_vm1 = vmmov 0   ;;  %s202_s1 = inlined_call_operand.vmem [shape: bf16[32,32], index: 1, kind: input, shape index: {}]   ;;  %s203_s0 = inlined_call_operand.vmem [shape: bf16[16,32], index: 0, kind: input, shape index: {}]   ;;  %s204_s2 = inlined_call_operand.vmem [shape: f32[1,32], index: 2, kind: input, shape index: {}]   ;;  %s205_s3 = inlined_call_operand.vmem [shape: f32[16,32], index: 3, kind: input, shape index: {}]   ;;  %s206_s4 = inlined_call_operand.vmem [shape: f32[16,32], index: 4, kind: output, shape index: {}]  }
   0x1   :  { %131 = vmatprep.subr.bf16.mxu0 %v144_v0  ;;  %v141_v1 = vld [vmem:[%s202_s1] sm:$0xff]   ;;  %135 = vmatprep.mubr.msk.bf16.mxu0 %vm145_vm1, %v144_v0  ;;  %23 = vst.msk [vmem:[#allocation2] sm:$0xff] %vm22_vm0, %v144_v0  ;;  %24 = vst.msk [vmem:[#allocation2 + $0x8] sm:$0xff] %vm22_vm0, %v144_v0  ;;  %v142_v2 = vld [vmem:[%s202_s1 + $0x8] sm:$0xff]  }
   0x2   :  { %132 = vmatpush3.bf16.msra.mxu0 %v141_v1  ;;  %v143_v3 = vld [vmem:[%s203_s0] sm:$0xff]   ;;  %v114_v17 = vld [vmem:[%s205_s3 + $0x8] sm:$0xff] }
   0x3   :  { %133 = vmatprep.subr.bf16.mxu0 %v144_v0  ;;  %v127_v12 = vld [vmem:[%s204_s2] ss:$0 sm:$0xff] }
   0x4   :  { %v113_v14 = vld [vmem:[%s205_s3] sm:$0xff] }
   0x6   :  { %134 = vmatpush3.bf16.msra.mxu0 %v142_v2 }
   0x8   :  { %v25_v4 = vld [vmem:[#allocation2] sm:$0xff]  ;;  %v26_v6 = vld [vmem:[#allocation2 + $0x8] sm:$0xff] }
   0x9   :  { %136 = vmatmul.mubr.msk.bf16.vlgmr.msra.gmra.mrb[0].mxu0 %vm22_vm0, %v143_v3 }
  0xdc   :  { %v88_v5 = vpop.f32.mrb[0].mxu0 }
  0xdd   :  { %v95_v7 = vadd.f32 %v88_v5, %v25_v4  ;;  %v137_v8 = vpop.f32.mrb[1].mxu0 }
  0xde   :  { %v91_v9 = vpop.f32.mrb[2].mxu0 }
  0xdf   :  { %97 = vst.msk [vmem:[#allocation2] sm:$0xff] %vm22_vm0, %v95_v7  ;;  %v96_v10 = vadd.f32 %v91_v9, %v26_v6  ;;  %v138_v11 = vpop.f32.mrb[3].mxu0 }
  0xe1   :  { %98 = vst.msk [vmem:[#allocation2 + $0x8] sm:$0xff] %vm22_vm0, %v96_v10 }
  0xe6   :  { %v102_v13 = vld [vmem:[#allocation2] sm:$0xff] }
  0xe7   :  { %v111_v15 = vadd.f32 %v127_v12, %v102_v13 }
  0xe8   :  { %v103_v16 = vld [vmem:[#allocation2 + $0x8] sm:$0xff] }
  0xe9   :  { %v115_v18 = vadd.f32 %v113_v14, %v111_v15  ;;  %v112_v19 = vadd.f32 %v127_v12, %v103_v16 }
  0xeb   :  { %117 = vst.msk [vmem:[%s206_s4] sm:$0xff] %vm22_vm0, %v115_v18  ;;  %v116_v20 = vadd.f32 %v114_v17, %v112_v19 }
  0xed   :  { %118 = vst.msk [vmem:[%s206_s4 + $0x8] sm:$0xff] %vm22_vm0, %v116_v20 }

// kernel: encoder_forward.9
= control target key start
LH: loop header
LB: loop body
LE: loop exit
PB: predicated region body
PF: predicated region fallthrough
CT: control target
= control target key end

     0   :  { %13 = vsyncpa [#allocation3], 0  ;;  %s252_s24 = smov [#allocation2]   ;;  %s355_s0 = inlined_call_operand.hbm [shape: f32[16,32], index: 0, kind: input, shape index: {}]   ;;  %s356_s1 = inlined_call_operand.vmem [shape: f32[1,32], index: 1, kind: input, shape index: {}]   ;;  %s357_s2 = inlined_call_operand.vmem [shape: f32[1,32], index: 2, kind: input, shape index: {}]   ;;  %s358_s3 = inlined_call_operand.vmem [shape: bf16[32,96], index: 3, kind: input, shape index: {}]   ;;  %s359_s4 = inlined_call_operand.vmem [shape: f32[1,96], index: 4, kind: input, shape index: {}]   ;;  %s360_s5 = inlined_call_operand.vmem [shape: bf16[16,32], index: 5, kind: output, shape index: {0}]   ;;  %s361_s6 = inlined_call_operand.vmem [shape: bf16[16,32], index: 6, kind: output, shape index: {1}]   ;;  %s362_s7 = inlined_call_operand.vmem [shape: bf16[16,32], index: 7, kind: output, shape index: {2}]  }
   0x1   :  { %s19_s25 = sshll.u32 %s252_s24, 4  ;;  %s228_s28 = scalar_lea.hbm %s355_s0, 256  ;;  %s20_s25 = int_to_ptr.vmem [resolvable:$true] %s19_s25 }
   0x2   :  { %p229_p0 = scmp.ne.s32.totalorder %s355_s0, %s228_s28  ;;  %p232_p1 = scmp.lt.u32.totalorder %s228_s28, %s355_s0 }
   0x4   :  { %p234_p2 = pnand %p232_p1, %p229_p0 }
   0x6   :  { %237 = shalt.err (!%p234_p2)
}
   0x7   :  { %s238_s10 = scalar_lea.vmem %s20_s25, 256  ;;  %p243_p4 = scmp.lt.s32.totalorder %s20_s25, %s20_s25 }
   0x8   :  { %p239_p3 = scmp.ne.s32.totalorder %s20_s25, %s238_s10  ;;  %p244_p5 = scmp.lt.s32.totalorder %s238_s10, %s238_s10 }
   0xa   :  { %p245_p6 = por %p244_p5, %p243_p4 }
   0xc   :  { %p246_p7 = pnand %p245_p6, %p239_p3 }
   0xe   :  { %249 = shalt.err (!%p246_p7)
}
   0xf   :  { %s253_s11 = smov 128   ;;  %s254_s12 = smov 8  }
  0x10   :  { %25 = dma.hbm_to_vmem [thread:$0]  %s355_s0, 256, %s20_s25, [#allocation3], %s253_s11, %s253_s11, %s254_s12  }
  0x11   :  { %250 = dma.done.wait [#allocation3], 256  }
  0x12   :  { %251 = vsyncadd [#allocation3], 4294967040  ;;  %vm40_vm0 = vcmask 261120   ;;  %v38_v0 = vld [vmem:[#allocation2] sm:$0xff]  ;;  %v39_v1 = vld [vmem:[#allocation2 + $0x8] sm:$0xff]  ;;  %v255_v15 = vmov 0.0  }
  0x13   :  { %v41_v2 = vsel %vm40_vm0, %v38_v0, 0.0  ;;  %v44_v3 = vsel %vm40_vm0, %v39_v1, 0.0  ;;  %v222_v14 = vld [vmem:[%s358_s3] sm:$0xff]   ;;  %207 = vmatprep.subr.bf16.mxu0 %v255_v15  ;;  %v223_v16 = vld [vmem:[%s358_s3 + $0x8] sm:$0xff]   ;;  %vm256_vm1 = vmmov 0   ;;  %vm162_vm2 = vcmask 257024  }
  0x14   :  { %42 = vadd.xlane.f32.xlu0 %v41_v2  ;;  %208 = vmatpush3.bf16.msra.mxu0 %v222_v14  ;;  %v194_v25 = vld [vmem:[%s356_s1] ss:$0 sm:$0xff]  ;;  %s257_s23 = smov 64   ;;  %s258_s24 = smov 96  }
  0x15   :  { %211 = vmatprep.mubr.msk.bf16.mxu0 %vm256_vm1, %v255_v15  ;;  %209 = vmatprep.subr.bf16.mxu0 %v255_v15  ;;  %v195_v29 = vld [vmem:[%s357_s2] ss:$0 sm:$0xff] }
  0x16   :  { %v196_v34 = vld [vmem:[%s359_s4] ss:$0 sm:$0xff] }
  0x18   :  { %45 = vadd.xlane.f32.xlu0 %v44_v3  ;;  %210 = vmatpush3.bf16.msra.mxu0 %v223_v16 }
  0xa1   :  { %v43_v4 = vpop.xlane.xlu0 %42 }
  0xa2   :  { %v48_v5 = vmul.f32 0.03125, %v43_v4 }
  0xa4   :  { %v50_v6 = vsub.f32 %v38_v0, %v48_v5 }
  0xa5   :  { %v46_v7 = vpop.xlane.xlu0 %45 }
  0xa6   :  { %v49_v8 = vmul.f32 0.03125, %v46_v7  ;;  %v52_v9 = vmul.f32 %v50_v6, %v50_v6 }
  0xa8   :  { %v51_v10 = vsub.f32 %v39_v1, %v49_v8  ;;  %v54_v11 = vsel %vm40_vm0, %v52_v9, 0.0 }
  0xa9   :  { %55 = vadd.xlane.f32.xlu1 %v54_v11 }
  0xaa   :  { %v53_v12 = vmul.f32 %v51_v10, %v51_v10 }
  0xac   :  { %v57_v13 = vsel %vm40_vm0, %v53_v12, 0.0 }
  0xad   :  { %58 = vadd.xlane.f32.xlu1 %v57_v13 }
 0x136   :  { %v56_v17 = vpop.xlane.xlu1 %55 }
 0x137   :  { %v60_v18 = vmul.f32 0.03125, %v56_v17 }
 0x139   :  { %v62_v19 = vadd.f32 1e-05, %v60_v18 }
 0x13a   :  { %v59_v20 = vpop.xlane.xlu1 %58 }
 0x13b   :  { %224 = vrsqrt.f32 %v62_v19  ;;  %v61_v21 = vmul.f32 0.03125, %v59_v20 }
 0x13d   :  { %v63_v22 = vadd.f32 1e-05, %v61_v21 }
 0x13f   :  { %226 = vrsqrt.f32 %v63_v22 }
 0x145   :  { %v225_v23 = vpop.eup %224 }
 0x146   :  { %v66_v24 = vmul.f32 %v225_v23, %v50_v6 }
 0x148   :  { %v75_v28 = vmul.f32 %v194_v25, %v66_v24 }
 0x149   :  { %v227_v26 = vpop.eup %226 }
 0x14a   :  { %v67_v27 = vmul.f32 %v227_v26, %v51_v10  ;;  %v84_v31 = vadd.f32 %v195_v29, %v75_v28 }
 0x14c   :  { %v76_v30 = vmul.f32 %v194_v25, %v67_v27 }
 0x14e   :  { %v85_v32 = vadd.f32 %v195_v29, %v76_v30 }
 0x150   :  { %v86_v33 = vpack.c.bf16 %v85_v32, %v84_v31 }
 0x152   :  { %212 = vmatmul.mubr.msk.bf16.vlgmr.msra.gmra.mrb[0].mxu0 %vm40_vm0, %v86_v33 }
 0x225   :  { %v147_v35 = vpop.f32.mrb[0].mxu0 }
 0x226   :  { %v148_v36 = vadd.f32 %v196_v34, %v147_v35  ;;  %v213_v37 = vpop.f32.mrb[1].mxu0 }
 0x227   :  { %v150_v38 = vpop.f32.mrb[2].mxu0 }
 0x228   :  { %v202_v39 = vpack.c.bf16 %v148_v36, %v148_v36  ;;  %v151_v40 = vadd.f32 %v196_v34, %v150_v38  ;;  %v214_v41 = vpop.f32.mrb[3].mxu0 }
 0x22a   :  { %163 = vst.msk [vmem:[%s360_s5] sm:$0xf] %vm162_vm2, %v202_v39  ;;  %v203_v42 = vpack.c.bf16 %v151_v40, %v151_v40  ;;  %173 = vrot.lane.b32.xlu1 %v202_v39, %s257_s23  ;;  %165 = vrot.lane.b32.xlu0 %v202_v39, %s258_s24 }
 0x22c   :  { %164 = vst.msk [vmem:[%s360_s5 + $0x4] sm:$0xf] %vm162_vm2, %v203_v42 }
 0x22e   :  { %167 = vrot.lane.b32.xlu1 %v203_v42, %s258_s24 }
 0x232   :  { %175 = vrot.lane.b32.xlu1 %v203_v42, %s257_s23 }
 0x29c   :  { %v174_v43 = vpop.permute.xlu1 %173  ;;  %v166_v44 = vpop.permute.xlu0 %165 }
 0x29d   :  { %179 = vst.msk [vmem:[%s362_s7] sm:$0xf] %vm162_vm2, %v174_v43  ;;  %171 = vst.msk [vmem:[%s361_s6] sm:$0xf] %vm162_vm2, %v166_v44 }
 0x2a0   :  { %v168_v45 = vpop.permute.xlu1 %167 }
 0x2a1   :  { %172 = vst.msk [vmem:[%s361_s6 + $0x4] sm:$0xf] %vm162_vm2, %v168_v45 }
 0x2a4   :  { %v176_v46 = vpop.permute.xlu1 %175 }
 0x2a5   :  { %180 = vst.msk [vmem:[%s362_s7 + $0x4] sm:$0xf] %vm162_vm2, %v176_v46 }
 0x2a6   :  { %193 = vsyncpa [#allocation3], 1 }

// kernel: encoder_forward.10
= control target key start
LH: loop header
LB: loop body
LE: loop exit
PB: predicated region body
PF: predicated region fallthrough
CT: control target
= control target key end

     0   :  { %s1275_s15 = smov 0   ;;  %s1277_s16 = smov 0   ;;  %s1486_s0 = inlined_call_operand.vmem [shape: bf16[16,32], index: 0, kind: input, shape index: {}]   ;;  %s1487_s1 = inlined_call_operand.vmem [shape: bf16[16,32], index: 1, kind: input, shape index: {}]   ;;  %s1488_s2 = inlined_call_operand.vmem [shape: bf16[16,32], index: 2, kind: input, shape index: {}]   ;;  %s1489_s3 = inlined_call_operand.vmem [shape: f32[2,1,8], index: 3, kind: input, shape index: {}]   ;;  %s1490_s4 = inlined_call_operand.vmem [shape: bf16[16,32], index: 4, kind: output, shape index: {}]  }
   0x1   :  { %s1279_s17 = smov 0  }
   0x2 LB: > { %s33_s18 = sadd.s32 1, %s1231_s16  ;;  %p1047_p0 = scmp.ge.s32.totalorder %s1235_s17, 1  ;;  %s1235_s17 = sphi %s1279_s17, %s14_s17   ;;  %s1231_s16 = sphi %s1277_s16, %s1492_s16   ;;  %s1227_s15 = sphi %s1275_s15, %s1491_s15  }
   0x3   : > { %p35_p1 = scmp.ge.s32.totalorder %s33_s18, 2  ;;  %p225_p2 = scmp.lt.s32.totalorder %s1235_s17, 3 }
   0x5   : > { %s1494_s18 = smov (%p35_p1, %s33_s18), 0  ;;  %p226_p3 = pnand %p1047_p0, %p225_p2 }
   0x6   : > { %p268_p4 = scmp.lt.s32.totalorder (!%p226_p3), %s1227_s15, 1  ;;  %v1237_v0 = vmov (!%p226_p3), 0.0   ;;  %vm1238_vm0 = vmmov (!%p226_p3), 0   ;;  %vm311_vm1 = vcmask (!%p226_p3), 64512   ;;  %vm302_vm2 = vcmask (!%p226_p3), 31744   ;;  %s1241_s29 = smov (!%p226_p3), 120  }
   0x7   : > { %229 = sbr.rel (%p226_p3) target bundleno = 1423 (0x58f), region = 36  ;;  %1088 = vmatprep.subr.bf16.mxu0 (!%p226_p3), %v1237_v0  ;;  %1090 = vmatprep.mubr.msk.bf16.mxu0 (!%p226_p3), %vm1238_vm0, %v1237_v0  ;;  %v1239_v4 = vmov (!%p226_p3), -inf   ;;  %304 = vst.msk [vmem:[#allocation3] sm:$0xff] (!%p226_p3), %vm302_vm2, %v1237_v0  ;;  %v1240_v13 = vmov (!%p226_p3), 0   ;;  %s1242_s30 = smov (!%p226_p3), 112   ;;  %vm388_vm3 = vcmask (!%p226_p3), 7168  }
   0x8   : > { %1094 = vmatprep.subr.bf16.mxu1 (!%p226_p3), %v1237_v0  ;;  %1096 = vmatprep.mubr.msk.bf16.mxu1 (!%p226_p3), %vm1238_vm0, %v1237_v0  ;;  %303 = vst.msk [vmem:[#allocation2] sm:$0xff] (!%p226_p3), %vm302_vm2, %v1239_v4  ;;  %s1243_s5 = smov (!%p226_p3), 104   ;;  %vm401_vm4 = vcmask (!%p226_p3), 1043456   ;;  %vm531_vm5 = vcmask (!%p226_p3), 15368   ;;  %vm305_vm6 = vcmask (!%p226_p3), 261120   ;;  %vm683_vm7 = vcmask (!%p226_p3), 23568  }
   0x9   : > { %1173 = vset.pattern.permute.xlu0 (!%p226_p3), %v1240_v13  ;;  %306 = vst.msk [vmem:[#allocation4] sm:$0xff] (!%p226_p3), %vm305_vm6, %v1237_v0  ;;  %vm835_vm8 = vcmask (!%p226_p3), 31768   ;;  %s1247_s9 = smov (!%p226_p3), 8   ;;  %s1248_s10 = smov (!%p226_p3), 16   ;;  %vm597_vm9 = vcmask (!%p226_p3), 130112   ;;  %vm749_vm10 = vcmask (!%p226_p3), 195712  }
   0xa   : > { %s1249_s11 = smov (!%p226_p3), 24   ;;  %vm901_vm11 = vcmask (!%p226_p3), 261312   ;;  %vm932_vm12 = vcmask (!%p226_p3), 130048   ;;  %vm934_vm13 = vcmask (!%p226_p3), 195584   ;;  %vm937_vm14 = vcmask (!%p226_p3), 257024  }
   0xe   : > { %s1496_s15 = smov (!%p268_p4, %s1227_s15), 1 }
   0xf   : > { %s1299_s19 = sshll.u32 %s1496_s15, 2  ;;  %s290_s28 = scalar_lea.vmem %s1489_s3, %s1496_s15  ;;  %v1341_v20 = vld [vmem:[#allocation2] sm:$0xff] }
  0x10   : > { %s1305_s22 = scalar_lea.vmem %s1487_s1, %s1299_s19  ;;  %s1312_s25 = scalar_lea.vmem %s1486_s0, %s1299_s19  ;;  %v1324_v6 = vld [vmem:[%s290_s28] ss:$0 sm:$0xff] }
  0x11   : > { %v309_v1 = vld [vmem:[%s1305_s22] sm:$0xf]  ;;  %s1355_s8 = scalar_lea.vmem %s1488_s2, %s1299_s19  ;;  %s295_s14 = scalar_lea.vmem %s1490_s4, %s1299_s19 }
  0x12   : > { %v316_v2 = vsel %vm311_vm1, %v309_v1, 0  ;;  %v308_v3 = vld [vmem:[%s1312_s25] sm:$0xf] }
  0x13   : > { %1089 = vmatpush3.bf16.xpose.msra.mxu0 %v316_v2  ;;  %v1186_v14 = vld [vmem:[%s1305_s22] ss:$0 sps:$4 sm:$0xff]   ;;  %v1244_v2 = vmov 1  }
  0x14   : > { %1106 = vmatprep.subr.bf16.mxu0 %v1237_v0  ;;  %459 = vrot.lane.b32.xlu1 %v1186_v14, %s1241_s29  ;;  %v1187_v15 = vld [vmem:[%s1312_s25] ss:$0 sps:$4 sm:$0xff]  }
  0x15   : > { %v1188_v16 = vld [vmem:[%s1305_s22] ss:$0 sps:$4 sm:$0xff]   ;;  %1174 = vset.pattern.permute.xlu1 %v1244_v2 }
  0x16   : > { %v1189_v17 = vld [vmem:[%s1312_s25] ss:$0 sps:$4 sm:$0xff]  }
  0x17   : > { %v1190_v18 = vld [vmem:[%s1305_s22] ss:$0 sps:$4 sm:$0xff]  }
  0x18   : > { %454 = vrot.lane.b32.xlu1 %v1187_v15, %s1241_s29  ;;  %v1191_v19 = vld [vmem:[%s1312_s25] ss:$0 sps:$4 sm:$0xff]  }
  0x19   : > { %v310_v24 = vld [vmem:[%s1355_s8] sm:$0xf] }
  0x1a   : > { %1091 = vmatmul.mubr.msk.bf16.vlgmr.msra.gmra.mrb[0].mxu0 %vm311_vm1, %v308_v3  ;;  %v403_v25 = vsel %vm401_vm4, %v310_v24, 0  ;;  %v1245_v3 = vmov 2  }
  0x1b   : > { %1108 = vmatprep.mubr.msk.bf16.mxu0 %vm1238_vm0, %v1237_v0  ;;  %1095 = vmatpush3.bf16.msra.mxu1 %v403_v25 }
  0x1c   : > { %611 = vrot.lane.b32.xlu1 %v1188_v16, %s1242_s30  ;;  %1100 = vmatprep.subr.bf16.mxu1 %v1237_v0 }
  0x20   : > { %606 = vrot.lane.b32.xlu1 %v1189_v17, %s1242_s30 }
  0x24   : > { %763 = vrot.lane.b32.xlu1 %v1190_v18, %s1243_s5 }
  0x28   : > { %758 = vrot.lane.b32.xlu1 %v1191_v19, %s1243_s5 }
  0x86   : > { %v460_v29 = vpop.permute.xlu1 %459 }
  0x87   : > { %v465_v32 = vsel %vm311_vm1, %v460_v29, 0 }
  0x8a   : > { %v455_v30 = vpop.permute.xlu1 %454 }
  0x8e   : > { %v612_v34 = vpop.permute.xlu1 %611 }
  0x8f   : > { %v617_v36 = vsel %vm311_vm1, %v612_v34, 0  ;;  %v390_v34 = vld [vmem:[#allocation4] sm:$0xff] }
  0x92   : > { %v607_v35 = vpop.permute.xlu1 %606 }
  0x96   : > { %v764_v37 = vpop.permute.xlu1 %763 }
  0x97   : > { %v769_v38 = vsel %vm311_vm1, %v764_v37, 0 }
  0x9a   : > { %v759_v39 = vpop.permute.xlu1 %758 }
  0xed   : > { %v352_v5 = vpop.f32.mrb[0].mxu0 }
  0xee   : > { %v358_v7 = vmul.f32 0.35355338, %v352_v5  ;;  %v1092_v8 = vpop.f32.mrb[1].mxu0 }
  0xef   : > { %v355_v9 = vpop.f32.mrb[2].mxu0 }
  0xf0   : > { %v1093_v10 = vpop.f32.mrb[3].mxu0  ;;  %v365_v11 = vadd.f32 %v1324_v6, %v358_v7  ;;  %v1192_v9 = vld [vmem:[%s1355_s8] ss:$0 sps:$4 sm:$0xff]  }
  0xf1   : > { %v1246_v10 = vmov 3  }
  0xf2   : > { %v367_v12 = vsel %vm311_vm1, %v365_v11, -inf }
  0xf3   : > { %368 = vmax.xlane.f32.xlu0 %v367_v12 }
 0x180   : > { %v369_v21 = vpop.xlane.xlu0 %368 }
 0x181   : > { %v1344_v22 = vmax.f32 %v1341_v20, %v369_v21  ;;  %v1193_v21 = vld [vmem:[%s1355_s8] ss:$0 sps:$4 sm:$0xff]  }
 0x183   : > { %v371_v23 = vsub.f32 %v1341_v20, %v1344_v22  ;;  %447 = vst.msk [vmem:[#allocation2] sm:$0xff] %vm388_vm3, %v1344_v22  ;;  %376 = vperm.xlu0 %1173, %v1344_v22   ;;  %v1194_v22 = vld [vmem:[%s1355_s8] ss:$0 sps:$4 sm:$0xff]  }
 0x185   : > { %v372_v8 = vmul.f32 1.442695, %v371_v23 }
 0x187   : > { %1175 = vset.pattern.permute.xlu0 %v1245_v3 }
 0x18a   : > { %v509_v5 = vld [vmem:[#allocation2] sm:$0xff] }
 0x202   : > { %v377_v26 = vpop.permute.xlu0 %376 }
 0x203   : > { %v379_v27 = vsub.f32 %v365_v11, %v377_v26 }
 0x205   : > { %v380_v28 = vmul.f32 1.442695, %v379_v27 }
 0x207   : > { %1195 = vpow2.f32 %v380_v28 }
 0x208   : > { %1197 = vpow2.f32 %v372_v8 }
 0x211   : > { %v1360_v31 = vpop.eup %1195 }
 0x212   : > { %v397_v33 = vpack.c.bf16 %v1360_v31, %v1360_v31  ;;  %v1416_v16 = vpop.eup %1197  ;;  %v384_v23 = vsel %vm311_vm1, %v1360_v31, 0.0 }
 0x214   : > { %1097 = vmatmul.mubr.msk.bf16.vlgmr.msra.gmra.mrb[0].mxu1 %vm311_vm1, %v397_v33 }
 0x215   : > { %1101 = vmatpush3.bf16.xpose.msra.mxu1 %v465_v32  ;;  %1102 = vmatprep.mubr.msk.bf16.mxu1 %vm1238_vm0, %v1237_v0 }
 0x216   : > { %1112 = vmatprep.subr.bf16.mxu1 %v1237_v0 }
 0x21c   : > { %1103 = vmatmul.mubr.msk.bf16.vlgmr.msra.gmra.mrb[4].mxu1 %vm311_vm1, %v455_v30 }
 0x21d   : > { %1113 = vmatpush3.bf16.xpose.msra.mxu1 %v617_v36  ;;  %1114 = vmatprep.mubr.msk.bf16.mxu1 %vm1238_vm0, %v1237_v0 }
 0x21e   : > { %1124 = vmatprep.subr.bf16.mxu1 %v1237_v0 }
 0x224   : > { %1115 = vmatmul.mubr.msk.bf16.vlgmr.msra.gmra.mrb[8].mxu1 %vm311_vm1, %v607_v35 }
 0x225   : > { %1125 = vmatpush3.bf16.xpose.msra.mxu1 %v769_v38  ;;  %1126 = vmatprep.mubr.msk.bf16.mxu1 %vm1238_vm0, %v1237_v0 }
 0x22c   : > { %1127 = vmatmul.mubr.msk.bf16.vlgmr.msra.gmra.mrb[12].mxu1 %vm311_vm1, %v759_v39 }
 0x2e7   : > { %v1379_v40 = vpop.f32.mrb[0].mxu1 }
 0x2e8   : > { %v1098_v41 = vpop.f32.mrb[1].mxu1 }
 0x2e9   : > { %v442_v42 = vpop.f32.mrb[2].mxu1 }
 0x2ea   : > { %v1099_v43 = vpop.f32.mrb[3].mxu1 }
 0x2ef   : > { %v501_v44 = vpop.f32.mrb[4].mxu1 }
 0x2f0   : > { %v507_v45 = vmul.f32 0.35355338, %v501_v44  ;;  %v1104_v46 = vpop.f32.mrb[5].mxu1 }
 0x2f1   : > { %v504_v47 = vpop.f32.mrb[6].mxu1 }
 0x2f2   : > { %v1105_v48 = vpop.f32.mrb[7].mxu1  ;;  %v1382_v49 = vadd.f32 %v1324_v6, %v507_v45 }
 0x2f4   : > { %v510_v50 = vsel %vm311_vm1, %v1382_v49, -inf }
 0x2f5   : > { %511 = vmax.xlane.f32.xlu1 %v510_v50 }
 0x2f7   : > { %v653_v51 = vpop.f32.mrb[8].mxu1 }
 0x2f8   : > { %v659_v52 = vmul.f32 0.35355338, %v653_v51  ;;  %v1116_v53 = vpop.f32.mrb[9].mxu1 }
 0x2f9   : > { %v656_v54 = vpop.f32.mrb[10].mxu1 }
 0x2fa   : > { %v1117_v55 = vpop.f32.mrb[11].mxu1  ;;  %v1387_v56 = vadd.f32 %v1324_v6, %v659_v52 }
 0x2fc   : > { %v662_v57 = vsel %vm311_vm1, %v1387_v56, -inf }
 0x2fd   : > { %663 = vmax.xlane.f32.xlu0 %v662_v57 }
 0x2ff   : > { %v805_v58 = vpop.f32.mrb[12].mxu1 }
 0x300   : > { %v811_v59 = vmul.f32 0.35355338, %v805_v58  ;;  %v1128_v60 = vpop.f32.mrb[13].mxu1 }
 0x301   : > { %v808_v61 = vpop.f32.mrb[14].mxu1 }
 0x302   : > { %v1129_v62 = vpop.f32.mrb[15].mxu1  ;;  %v1392_v63 = vadd.f32 %v1324_v6, %v811_v59 }
 0x304   : > { %v814_v1 = vsel %vm311_vm1, %v1392_v63, -inf }
 0x305   : > { %815 = vmax.xlane.f32.xlu1 %v814_v1 }
 0x382   : > { %v512_v4 = vpop.xlane.xlu1 %511 }
 0x383   : > { %v513_v7 = vmax.f32 %v509_v5, %v512_v4 }
 0x385   : > { %v514_v6 = vsub.f32 %v509_v5, %v513_v7  ;;  %599 = vst.msk [vmem:[#allocation2] sm:$0xff] %vm531_vm5, %v513_v7  ;;  %519 = vperm.xlu1 %1174, %v513_v7  }
 0x387   : > { %v515_v24 = vmul.f32 1.442695, %v514_v6 }
 0x389   : > { %544 = vrot.lane.b32.xlu1 %v1192_v9, %s1241_s29  ;;  %1199 = vpow2.f32 %v515_v24 }
 0x38a   : > { %1176 = vset.pattern.permute.xlu1 %v1246_v10  ;;  %v664_v11 = vpop.xlane.xlu0 %663 }
 0x38c   : > { %v1405_v12 = vld [vmem:[#allocation2] sm:$0xff] }
 0x38d   : > { %v1409_v14 = vmax.f32 %v1405_v12, %v664_v11 }
 0x38f   : > { %v666_v15 = vsub.f32 %v1405_v12, %v1409_v14  ;;  %751 = vst.msk [vmem:[#allocation2] sm:$0xff] %vm683_vm7, %v1409_v14  ;;  %671 = vperm.xlu0 %1175, %v1409_v14  }
 0x391   : > { %v667_v50 = vmul.f32 1.442695, %v666_v15 }
 0x392   : > { %v816_v17 = vpop.xlane.xlu1 %815 }
 0x393   : > { %1177 = vset.pattern.permute.xlu0 %v1240_v13  ;;  %v1200_v25 = vpop.eup %1199 }
 0x394   : > { %393 = vperm.xlu0 %1177, %v1416_v16  }
 0x396   : > { %v1420_v18 = vld [vmem:[#allocation2] sm:$0xff] }
 0x397   : > { %v1423_v19 = vmax.f32 %v1420_v18, %v816_v17 }
 0x398   : > { %1180 = vset.pattern.permute.xlu0 %v1246_v10 }
 0x399   : > { %v818_v20 = vsub.f32 %v1420_v18, %v1423_v19  ;;  %903 = vst.msk [vmem:[#allocation2] sm:$0xff] %vm835_vm8, %v1423_v19  ;;  %823 = vperm.xlu1 %1176, %v1423_v19  }
 0x39d   : > { %696 = vrot.lane.b32.xlu1 %v1193_v21, %s1242_s30 }
 0x39e   : > { %1178 = vset.pattern.permute.xlu1 %v1244_v2 }
 0x3a1   : > { %848 = vrot.lane.b32.xlu1 %v1194_v22, %s1243_s5 }
 0x3c5   : > { %385 = vadd.xlane.f32.xlu1 %v384_v23 }
 0x3d6   : > { %536 = vperm.xlu1 %1178, %v1200_v25  }
 0x3da   : > { %1179 = vset.pattern.permute.xlu1 %v1245_v3 }
 0x404   : > { %v520_v26 = vpop.permute.xlu1 %519 }
 0x405   : > { %v522_v27 = vsub.f32 %v1382_v49, %v520_v26 }
 0x407   : > { %v523_v28 = vmul.f32 1.442695, %v522_v27 }
 0x408   : > { %v545_v29 = vpop.permute.xlu1 %544 }
 0x409   : > { %1201 = vpow2.f32 %v523_v28  ;;  %v550_v30 = vsel %vm401_vm4, %v545_v29, 0 }
 0x40a   : > { %1107 = vmatpush3.bf16.msra.mxu0 %v550_v30 }
 0x40b   : > { %1118 = vmatprep.subr.bf16.mxu0 %v1237_v0 }
 0x40e   : > { %v672_v32 = vpop.permute.xlu0 %671 }
 0x40f   : > { %v674_v31 = vsub.f32 %v1387_v56, %v672_v32  ;;  %v382_v56 = vld [vmem:[#allocation3] sm:$0xff] }
 0x410   : > { %v383_v57 = vmul.f32 %v1416_v16, %v382_v56 }
 0x411   : > { %v675_v33 = vmul.f32 1.442695, %v674_v31 }
 0x413   : > { %v1202_v35 = vpop.eup %1201  ;;  %1203 = vpow2.f32 %v675_v33  ;;  %v394_v36 = vpop.permute.xlu0 %393 }
 0x414   : > { %v396_v37 = vmul.f32 %v394_v36, %v390_v34  ;;  %v527_v38 = vsel %vm311_vm1, %v1202_v35, 0.0  ;;  %v540_v39 = vpack.c.bf16 %v1202_v35, %v1202_v35 }
 0x415   : > { %528 = vadd.xlane.f32.xlu0 %v527_v38 }
 0x416   : > { %v445_v41 = vadd.f32 %v1379_v40, %v396_v37  ;;  %1109 = vmatmul.mubr.msk.bf16.vlgmr.msra.gmra.mrb[4].mxu0 %vm311_vm1, %v540_v39 }
 0x417   : > { %1120 = vmatprep.mubr.msk.bf16.mxu0 %vm1238_vm0, %v1237_v0 }
 0x418   : > { %446 = vst.msk [vmem:[#allocation4] sm:$0xff] %vm311_vm1, %v445_v41  ;;  %v824_v42 = vpop.permute.xlu1 %823 }
 0x419   : > { %v826_v43 = vsub.f32 %v1392_v63, %v824_v42  ;;  %v819_v63 = vmul.f32 1.442695, %v818_v20 }
 0x41b   : > { %v827_v44 = vmul.f32 1.442695, %v826_v43 }
 0x41c   : > { %v697_v45 = vpop.permute.xlu1 %696 }
 0x41d   : > { %v1204_v46 = vpop.eup %1203  ;;  %1205 = vpow2.f32 %v827_v44  ;;  %v702_v47 = vsel %vm401_vm4, %v697_v45, 0 }
 0x41e   : > { %1119 = vmatpush3.bf16.msra.mxu0 %v702_v47  ;;  %v679_v48 = vsel %vm311_vm1, %v1204_v46, 0.0  ;;  %v692_v40 = vpack.c.bf16 %v1204_v46, %v1204_v46  ;;  %1207 = vpow2.f32 %v667_v50 }
 0x41f   : > { %680 = vadd.xlane.f32.xlu1 %v679_v48  ;;  %1130 = vmatprep.subr.bf16.mxu0 %v1237_v0  ;;  %1209 = vpow2.f32 %v819_v63  ;;  %v533_v27 = vld [vmem:[#allocation4] sm:$0xff] }
 0x420   : > { %v849_v49 = vpop.permute.xlu1 %848 }
 0x421   : > { %1121 = vmatmul.mubr.msk.bf16.vlgmr.msra.gmra.mrb[8].mxu0 %vm311_vm1, %v692_v40  ;;  %v854_v51 = vsel %vm401_vm4, %v849_v49, 0 }
 0x422   : > { %1131 = vmatpush3.bf16.msra.mxu0 %v854_v51  ;;  %1132 = vmatprep.mubr.msk.bf16.mxu0 %vm1238_vm0, %v1237_v0 }
 0x427   : > { %v1206_v52 = vpop.eup %1205 }
 0x428   : > { %v831_v53 = vsel %vm311_vm1, %v1206_v52, 0.0  ;;  %v844_v54 = vpack.c.bf16 %v1206_v52, %v1206_v52  ;;  %v1208_v55 = vpop.eup %1207 }
 0x429   : > { %832 = vadd.xlane.f32.xlu0 %v831_v53  ;;  %v1210_v8 = vpop.eup %1209 }
 0x42a   : > { %1133 = vmatmul.mubr.msk.bf16.vlgmr.msra.gmra.mrb[12].mxu0 %vm311_vm1, %v844_v54 }
 0x430   : > { %688 = vperm.xlu1 %1179, %v1208_v55  }
 0x434   : > { %1181 = vset.pattern.permute.xlu1 %v1240_v13 }
 0x452   : > { %v386_v58 = vpop.xlane.xlu1 %385 }
 0x453   : > { %v387_v59 = vadd.f32 %v386_v58, %v383_v57 }
 0x455   : > { %389 = vst.msk [vmem:[#allocation3] sm:$0xff] %vm388_vm3, %v387_v59 }
 0x456   : > { %v537_v1 = vpop.permute.xlu1 %536 }
 0x457   : > { %v539_v28 = vmul.f32 %v537_v1, %v533_v27 }
 0x45c   : > { %v525_v0 = vld [vmem:[#allocation3] sm:$0xff] }
 0x45d   : > { %v526_v60 = vmul.f32 %v1200_v25, %v525_v0 }
 0x4a2   : > { %v529_v61 = vpop.xlane.xlu0 %528 }
 0x4a3   : > { %v530_v62 = vadd.f32 %v529_v61, %v526_v60 }
 0x4a5   : > { %532 = vst.msk [vmem:[#allocation3] sm:$0xff] %vm531_vm5, %v530_v62 }
 0x4ac   : > { %v677_v4 = vld [vmem:[#allocation3] sm:$0xff]  ;;  %v681_v5 = vpop.xlane.xlu1 %680 }
 0x4ad   : > { %v678_v13 = vmul.f32 %v1208_v55, %v677_v4 }
 0x4af   : > { %v682_v7 = vadd.f32 %v681_v5, %v678_v13 }
 0x4b0   : > { %v689_v32 = vpop.permute.xlu1 %688 }
 0x4b1   : > { %684 = vst.msk [vmem:[#allocation3] sm:$0xff] %vm683_vm7, %v682_v7 }
 0x4b6   : > { %v833_v11 = vpop.xlane.xlu0 %832 }
 0x4b8   : > { %v829_v6 = vld [vmem:[#allocation3] sm:$0xff] }
 0x4b9   : > { %v830_v9 = vmul.f32 %v1210_v8, %v829_v6 }
 0x4bb   : > { %v834_v12 = vadd.f32 %v833_v11, %v830_v9 }
 0x4bd   : > { %836 = vst.msk [vmem:[#allocation3] sm:$0xff] %vm835_vm8, %v834_v12 }
 0x4c4   : > { %v907_v14 = vld [vmem:[#allocation3] sm:$0xff] }
 0x4c5   : > { %1211 = vrcp.f32 %v907_v14 }
 0x4cf   : > { %v1212_v15 = vpop.eup %1211 }
 0x4d0   : > { %912 = vperm.xlu1 %1181, %v1212_v15  }
 0x4d4   : > { %1183 = vset.pattern.permute.xlu1 %v1245_v3 }
 0x4d5   : > { %922 = vperm.xlu1 %1183, %v1212_v15  }
 0x4d9   : > { %1184 = vset.pattern.permute.xlu1 %v1246_v10 }
 0x4da   : > { %927 = vperm.xlu1 %1184, %v1212_v15  }
 0x4e9   : > { %v586_v16 = vpop.f32.mrb[4].mxu0 }
 0x4ea   : > { %593 = vrot.lane.b32.xlu0 %v586_v16, %s1247_s9  ;;  %v1110_v17 = vpop.f32.mrb[5].mxu0 }
 0x4eb   : > { %v589_v18 = vpop.f32.mrb[6].mxu0 }
 0x4ec   : > { %v1111_v19 = vpop.f32.mrb[7].mxu0 }
 0x4f4   : > { %v738_v20 = vpop.f32.mrb[8].mxu0 }
 0x4f5   : > { %745 = vrot.lane.b32.xlu0 %v738_v20, %s1248_s10  ;;  %v1122_v21 = vpop.f32.mrb[9].mxu0 }
 0x4f6   : > { %v741_v22 = vpop.f32.mrb[10].mxu0 }
 0x4f7   : > { %v1123_v23 = vpop.f32.mrb[11].mxu0 }
 0x4f9   : > { %840 = vperm.xlu0 %1180, %v1210_v8  }
 0x4fd   : > { %v890_v24 = vpop.f32.mrb[12].mxu0  ;;  %1182 = vset.pattern.permute.xlu0 %v1244_v2 }
 0x4fe   : > { %897 = vrot.lane.b32.xlu0 %v890_v24, %s1249_s11  ;;  %v1134_v3 = vpop.f32.mrb[13].mxu0 }
 0x4ff   : > { %v893_v25 = vpop.f32.mrb[14].mxu0 }
 0x500   : > { %v1135_v26 = vpop.f32.mrb[15].mxu0 }
 0x502   : > { %917 = vperm.xlu0 %1182, %v1212_v15  }
 0x506   : > { %1185 = vset.pattern.permute.xlu0 %v1246_v10 }
 0x54f   : > { %v913_v38 = vpop.permute.xlu1 %912 }
 0x554   : > { %v923_v41 = vpop.permute.xlu1 %922 }
 0x559   : > { %v928_v47 = vpop.permute.xlu1 %927 }
 0x55c   : > { %v594_v29 = vpop.permute.xlu0 %593 }
 0x55d   : > { %v596_v30 = vadd.f32 %v594_v29, %v539_v28 }
 0x55f   : > { %598 = vst.msk [vmem:[#allocation4] sm:$0xff] %vm597_vm9, %v596_v30 }
 0x566   : > { %v685_v31 = vld [vmem:[#allocation4] sm:$0xff] }
 0x567   : > { %v691_v33 = vmul.f32 %v689_v32, %v685_v31  ;;  %v746_v34 = vpop.permute.xlu0 %745 }
 0x569   : > { %v748_v2 = vadd.f32 %v746_v34, %v691_v33 }
 0x56b   : > { %750 = vst.msk [vmem:[#allocation4] sm:$0xff] %vm749_vm10, %v748_v2 }
 0x572   : > { %v837_v36 = vld [vmem:[#allocation4] sm:$0xff] }
 0x578   : > { %v841_v35 = vpop.permute.xlu0 %840 }
 0x579   : > { %v843_v37 = vmul.f32 %v841_v35, %v837_v36 }
 0x57c   : > { %v898_v10 = vpop.permute.xlu0 %897 }
 0x57d   : > { %v900_v39 = vadd.f32 %v898_v10, %v843_v37 }
 0x57f   : > { %902 = vst.msk [vmem:[#allocation4] sm:$0xff] %vm901_vm11, %v900_v39 }
 0x581   : > { %v918_v43 = vpop.permute.xlu0 %917 }
 0x586   : > { %v909_v42 = vld [vmem:[#allocation4] sm:$0xff] }
 0x587   : > { %v915_v44 = vmul.f32 %v913_v38, %v909_v42  ;;  %v925_v45 = vmul.f32 %v923_v41, %v909_v42  ;;  %v920_v46 = vmul.f32 %v918_v43, %v909_v42  ;;  %v930_v48 = vmul.f32 %v928_v47, %v909_v42 }
 0x589   : > { %v931_v40 = vsel %vm311_vm1, %v915_v44, %v920_v46 }
 0x58a   : > { %v933_v49 = vsel %vm932_vm12, %v931_v40, %v925_v45 }
 0x58b   : > { %v935_v50 = vsel %vm934_vm13, %v933_v49, %v930_v48 }
 0x58c   : > { %v936_v51 = vpack.c.bf16 %v935_v50, %v935_v50 }
 0x58e   : > { %938 = vst.msk [vmem:[%s295_s14] sm:$0xf] %vm937_vm14, %v936_v51 }
 0x58f PF: > { %s14_s17 = sadd.s32 1, %s1235_s17   ;;  %s1491_s15 = smov %s1231_s16 }
 0x590   : > { %p11_p5 = scmp.ge.s32.totalorder %s14_s17, 4   ;;  %s1492_s16 = smov %s1494_s18 }
 0x592   :  { %13 = sbr.rel (!%p11_p5) target bundleno = 2 (0x2), region = 83 }

// kernel: encoder_forward.12
= control target key start
LH: loop header
LB: loop body
LE: loop exit
PB: predicated region body
PF: predicated region fallthrough
CT: control target
= control target key end

     0   :  { %vm33_vm0 = vcmask 261120   ;;  %v314_v15 = vmov 0.0   ;;  %vm315_vm1 = vmmov 0   ;;  %vm189_vm2 = vcmask 523264   ;;  %s420_s0 = inlined_call_operand.vmem [shape: f32[16,32], index: 0, kind: input, shape index: {}]   ;;  %s421_s3 = inlined_call_operand.vmem [shape: bf16[32,64], index: 3, kind: input, shape index: {}]   ;;  %s422_s5 = inlined_call_operand.vmem [shape: bf16[64,32], index: 5, kind: input, shape index: {}]   ;;  %s423_s1 = inlined_call_operand.vmem [shape: f32[1,32], index: 1, kind: input, shape index: {}]   ;;  %s424_s2 = inlined_call_operand.vmem [shape: f32[1,32], index: 2, kind: input, shape index: {}]   ;;  %s425_s4 = inlined_call_operand.vmem [shape: f32[1,64], index: 4, kind: input, shape index: {}]   ;;  %s426_s6 = inlined_call_operand.vmem [shape: f32[1,32], index: 6, kind: input, shape index: {}]   ;;  %s427_s7 = inlined_call_operand.vmem [shape: f32[16,32], index: 7, kind: output, shape index: {}]  }
   0x1   :  { %v359_v0 = vld [vmem:[%s420_s0] sm:$0xff]  ;;  %v364_v1 = vld [vmem:[%s420_s0 + $0x8] sm:$0xff]  ;;  %282 = vmatprep.subr.bf16.mxu0 %v314_v15  ;;  %81 = vst.msk [vmem:[#allocation3] sm:$0xff] %vm33_vm0, %v314_v15  ;;  %82 = vst.msk [vmem:[#allocation3 + $0x8] sm:$0xff] %vm33_vm0, %v314_v15  ;;  %290 = vmatprep.subr.bf16.mxu1 %v314_v15 }
   0x2   :  { %v34_v2 = vsel %vm33_vm0, %v359_v0, 0.0  ;;  %v37_v3 = vsel %vm33_vm0, %v364_v1, 0.0  ;;  %v304_v14 = vld [vmem:[%s421_s3] sm:$0xff]   ;;  %v305_v16 = vld [vmem:[%s421_s3 + $0x8] sm:$0xff]   ;;  %286 = vmatprep.mubr.msk.bf16.mxu0 %vm315_vm1, %v314_v15  ;;  %298 = vmatprep.mubr.msk.bf16.mxu1 %vm315_vm1, %v314_v15  ;;  %v308_v37 = vld [vmem:[%s422_s5 + $0x10] sm:$0xff]  }
   0x3   :  { %35 = vadd.xlane.f32.xlu0 %v34_v2  ;;  %283 = vmatpush3.bf16.msra.mxu0 %v304_v14  ;;  %v306_v17 = vld [vmem:[%s422_s5] sm:$0xff]   ;;  %v307_v18 = vld [vmem:[%s422_s5 + $0x8] sm:$0xff]   ;;  %v309_v38 = vld [vmem:[%s422_s5 + $0x18] sm:$0xff]  }
   0x4   :  { %284 = vmatprep.subr.bf16.mxu0 %v314_v15  ;;  %291 = vmatpush3.bf16.msra.mxu1 %v306_v17  ;;  %v262_v27 = vld [vmem:[%s423_s1] ss:$0 sm:$0xff] }
   0x5   :  { %292 = vmatprep.subr.bf16.mxu1 %v314_v15  ;;  %v263_v31 = vld [vmem:[%s424_s2] ss:$0 sm:$0xff] }
   0x6   :  { %v264_v39 = vld [vmem:[%s425_s4] ss:$0 sm:$0xff] }
   0x7   :  { %38 = vadd.xlane.f32.xlu0 %v37_v3  ;;  %285 = vmatpush3.bf16.msra.mxu0 %v305_v16  ;;  %v273_v58 = vld [vmem:[%s426_s6] ss:$0 sm:$0xff] }
   0x8   :  { %293 = vmatpush3.bf16.msra.mxu1 %v307_v18  ;;  %v154_v49 = vld [vmem:[#allocation3] sm:$0xff]  ;;  %v155_v51 = vld [vmem:[#allocation3 + $0x8] sm:$0xff] }
   0x9   :  { %294 = vmatprep.subr.bf16.mxu1 %v314_v15 }
   0xc   :  { %295 = vmatpush3.bf16.msra.mxu1 %v308_v37 }
   0xd   :  { %296 = vmatprep.subr.bf16.mxu1 %v314_v15 }
  0x10   :  { %297 = vmatpush3.bf16.msra.mxu1 %v309_v38 }
  0x90   :  { %v36_v4 = vpop.xlane.xlu0 %35 }
  0x91   :  { %v41_v5 = vmul.f32 0.03125, %v36_v4 }
  0x93   :  { %v43_v6 = vsub.f32 %v359_v0, %v41_v5 }
  0x94   :  { %v39_v7 = vpop.xlane.xlu0 %38 }
  0x95   :  { %v42_v8 = vmul.f32 0.03125, %v39_v7  ;;  %v45_v9 = vmul.f32 %v43_v6, %v43_v6 }
  0x97   :  { %v44_v10 = vsub.f32 %v364_v1, %v42_v8  ;;  %v47_v11 = vsel %vm33_vm0, %v45_v9, 0.0 }
  0x98   :  { %48 = vadd.xlane.f32.xlu1 %v47_v11 }
  0x99   :  { %v46_v12 = vmul.f32 %v44_v10, %v44_v10 }
  0x9b   :  { %v50_v13 = vsel %vm33_vm0, %v46_v12, 0.0 }
  0x9c   :  { %51 = vadd.xlane.f32.xlu1 %v50_v13 }
 0x125   :  { %v49_v19 = vpop.xlane.xlu1 %48 }
 0x126   :  { %v53_v20 = vmul.f32 0.03125, %v49_v19 }
 0x128   :  { %v55_v21 = vadd.f32 1e-05, %v53_v20 }
 0x129   :  { %v52_v22 = vpop.xlane.xlu1 %51 }
 0x12a   :  { %310 = vrsqrt.f32 %v55_v21  ;;  %v54_v23 = vmul.f32 0.03125, %v52_v22 }
 0x12c   :  { %v56_v24 = vadd.f32 1e-05, %v54_v23 }
 0x12e   :  { %312 = vrsqrt.f32 %v56_v24 }
 0x134   :  { %v311_v25 = vpop.eup %310 }
 0x135   :  { %v59_v26 = vmul.f32 %v311_v25, %v43_v6 }
 0x137   :  { %v68_v29 = vmul.f32 %v262_v27, %v59_v26 }
 0x138   :  { %v313_v28 = vpop.eup %312 }
 0x139   :  { %v60_v30 = vmul.f32 %v313_v28, %v44_v10  ;;  %v77_v33 = vadd.f32 %v263_v31, %v68_v29 }
 0x13b   :  { %v69_v32 = vmul.f32 %v262_v27, %v60_v30 }
 0x13d   :  { %v78_v34 = vadd.f32 %v263_v31, %v69_v32 }
 0x13f   :  { %v79_v35 = vpack.c.bf16 %v78_v34, %v77_v33 }
 0x141   :  { %80 = vst.msk [vmem:[#allocation2] sm:$0xff] %vm33_vm0, %v79_v35 }
 0x148   :  { %v83_v36 = vld [vmem:[#allocation2] sm:$0xff] }
 0x149   :  { %287 = vmatmul.mubr.msk.bf16.vlgmr.msra.gmra.mrb[0].mxu0 %vm33_vm0, %v83_v36 }
 0x21c   :  { %v145_v40 = vpop.f32.mrb[0].mxu0 }
 0x21d   :  { %v146_v41 = vadd.f32 %v264_v39, %v145_v40  ;;  %v288_v42 = vpop.f32.mrb[1].mxu0 }
 0x21e   :  { %v148_v43 = vpop.f32.mrb[2].mxu0 }
 0x21f   :  { %v149_v44 = vadd.f32 %v264_v39, %v148_v43  ;;  %v289_v45 = vpop.f32.mrb[3].mxu0  ;;  %v152_v46 = vmax.f32 %v146_v41, 0.0 }
 0x221   :  { %v153_v47 = vmax.f32 %v149_v44, 0.0 }
 0x223   :  { %v156_v48 = vpack.c.bf16 %v153_v47, %v152_v46 }
 0x225   :  { %299 = vmatmul.mubr.msk.bf16.vlgmr.msra.gmra.mrb[0].mxu1 %vm189_vm2, %v156_v48 }
 0x2f8   :  { %v227_v50 = vpop.f32.mrb[0].mxu1 }
 0x2f9   :  { %v234_v52 = vadd.f32 %v227_v50, %v154_v49  ;;  %v300_v53 = vpop.f32.mrb[1].mxu1 }
 0x2fa   :  { %v230_v54 = vpop.f32.mrb[2].mxu1 }
 0x2fb   :  { %236 = vst.msk [vmem:[#allocation3] sm:$0xff] %vm33_vm0, %v234_v52  ;;  %v235_v55 = vadd.f32 %v230_v54, %v155_v51  ;;  %v301_v56 = vpop.f32.mrb[3].mxu1 }
 0x2fd   :  { %237 = vst.msk [vmem:[#allocation3 + $0x8] sm:$0xff] %vm33_vm0, %v235_v55 }
 0x302   :  { %v243_v57 = vld [vmem:[#allocation3] sm:$0xff] }
 0x303   :  { %v245_v59 = vadd.f32 %v243_v57, %v359_v0 }
 0x304   :  { %v244_v60 = vld [vmem:[#allocation3 + $0x8] sm:$0xff] }
 0x305   :  { %v254_v61 = vadd.f32 %v273_v58, %v245_v59  ;;  %v246_v62 = vadd.f32 %v244_v60, %v364_v1 }
 0x307   :  { %256 = vst.msk [vmem:[%s427_s7] sm:$0xff] %vm33_vm0, %v254_v61  ;;  %v255_v63 = vadd.f32 %v273_v58, %v246_v62 }
 0x309   :  { %257 = vst.msk [vmem:[%s427_s7 + $0x8] sm:$0xff] %vm33_vm0, %v255_v63 }

// kernel: encoder_forward.13
= control target key start
LH: loop header
LB: loop body
LE: loop exit
PB: predicated region body
PF: predicated region fallthrough
CT: control target
= control target key end

     0   :  { %vm26_vm0 = vcmask 261120   ;;  %v210_v15 = vmov 0.0   ;;  %vm211_vm1 = vmmov 0   ;;  %vm148_vm2 = vcmask 257024   ;;  %s212_s13 = smov 64   ;;  %s213_s14 = smov 96   ;;  %s304_s0 = inlined_call_operand.vmem [shape: f32[16,32], index: 0, kind: input, shape index: {}]   ;;  %s305_s3 = inlined_call_operand.vmem [shape: bf16[32,96], index: 3, kind: input, shape index: {}]   ;;  %s306_s1 = inlined_call_operand.vmem [shape: f32[1,32], index: 1, kind: input, shape index: {}]   ;;  %s307_s2 = inlined_call_operand.vmem [shape: f32[1,32], index: 2, kind: input, shape index: {}]   ;;  %s308_s4 = inlined_call_operand.vmem [shape: f32[1,96], index: 4, kind: input, shape index: {}]   ;;  %s309_s5 = inlined_call_operand.vmem [shape: bf16[16,32], index: 5, kind: output, shape index: {0}]   ;;  %s310_s7 = inlined_call_operand.vmem [shape: bf16[16,32], index: 7, kind: output, shape index: {2}]   ;;  %s311_s6 = inlined_call_operand.vmem [shape: bf16[16,32], index: 6, kind: output, shape index: {1}]  }
   0x1   :  { %v24_v0 = vld [vmem:[%s304_s0] sm:$0xff]  ;;  %v25_v1 = vld [vmem:[%s304_s0 + $0x8] sm:$0xff]  ;;  %192 = vmatprep.subr.bf16.mxu0 %v210_v15  ;;  %196 = vmatprep.mubr.msk.bf16.mxu0 %vm211_vm1, %v210_v15 }
   0x2   :  { %v27_v2 = vsel %vm26_vm0, %v24_v0, 0.0  ;;  %v30_v3 = vsel %vm26_vm0, %v25_v1, 0.0  ;;  %v204_v14 = vld [vmem:[%s305_s3] sm:$0xff]   ;;  %v205_v16 = vld [vmem:[%s305_s3 + $0x8] sm:$0xff]  }
   0x3   :  { %28 = vadd.xlane.f32.xlu0 %v27_v2  ;;  %193 = vmatpush3.bf16.msra.mxu0 %v204_v14  ;;  %v179_v25 = vld [vmem:[%s306_s1] ss:$0 sm:$0xff] }
   0x4   :  { %194 = vmatprep.subr.bf16.mxu0 %v210_v15  ;;  %v180_v29 = vld [vmem:[%s307_s2] ss:$0 sm:$0xff] }
   0x5   :  { %v181_v34 = vld [vmem:[%s308_s4] ss:$0 sm:$0xff] }
   0x7   :  { %31 = vadd.xlane.f32.xlu0 %v30_v3  ;;  %195 = vmatpush3.bf16.msra.mxu0 %v205_v16 }
  0x90   :  { %v29_v4 = vpop.xlane.xlu0 %28 }
  0x91   :  { %v34_v5 = vmul.f32 0.03125, %v29_v4 }
  0x93   :  { %v36_v6 = vsub.f32 %v24_v0, %v34_v5 }
  0x94   :  { %v32_v7 = vpop.xlane.xlu0 %31 }
  0x95   :  { %v35_v8 = vmul.f32 0.03125, %v32_v7  ;;  %v38_v9 = vmul.f32 %v36_v6, %v36_v6 }
  0x97   :  { %v37_v10 = vsub.f32 %v25_v1, %v35_v8  ;;  %v40_v11 = vsel %vm26_vm0, %v38_v9, 0.0 }
  0x98   :  { %41 = vadd.xlane.f32.xlu1 %v40_v11 }
  0x99   :  { %v39_v12 = vmul.f32 %v37_v10, %v37_v10 }
  0x9b   :  { %v43_v13 = vsel %vm26_vm0, %v39_v12, 0.0 }
  0x9c   :  { %44 = vadd.xlane.f32.xlu1 %v43_v13 }
 0x125   :  { %v42_v17 = vpop.xlane.xlu1 %41 }
 0x126   :  { %v46_v18 = vmul.f32 0.03125, %v42_v17 }
 0x128   :  { %v48_v19 = vadd.f32 1e-05, %v46_v18 }
 0x129   :  { %v45_v20 = vpop.xlane.xlu1 %44 }
 0x12a   :  { %206 = vrsqrt.f32 %v48_v19  ;;  %v47_v21 = vmul.f32 0.03125, %v45_v20 }
 0x12c   :  { %v49_v22 = vadd.f32 1e-05, %v47_v21 }
 0x12e   :  { %208 = vrsqrt.f32 %v49_v22 }
 0x134   :  { %v207_v23 = vpop.eup %206 }
 0x135   :  { %v52_v24 = vmul.f32 %v207_v23, %v36_v6 }
 0x137   :  { %v61_v28 = vmul.f32 %v179_v25, %v52_v24 }
 0x138   :  { %v209_v26 = vpop.eup %208 }
 0x139   :  { %v53_v27 = vmul.f32 %v209_v26, %v37_v10  ;;  %v70_v31 = vadd.f32 %v180_v29, %v61_v28 }
 0x13b   :  { %v62_v30 = vmul.f32 %v179_v25, %v53_v27 }
 0x13d   :  { %v71_v32 = vadd.f32 %v180_v29, %v62_v30 }
 0x13f   :  { %v72_v33 = vpack.c.bf16 %v71_v32, %v70_v31 }
 0x141   :  { %197 = vmatmul.mubr.msk.bf16.vlgmr.msra.gmra.mrb[0].mxu0 %vm26_vm0, %v72_v33 }
 0x214   :  { %v133_v35 = vpop.f32.mrb[0].mxu0 }
 0x215   :  { %v134_v36 = vadd.f32 %v181_v34, %v133_v35  ;;  %v198_v37 = vpop.f32.mrb[1].mxu0 }
 0x216   :  { %v136_v38 = vpop.f32.mrb[2].mxu0 }
 0x217   :  { %v187_v39 = vpack.c.bf16 %v134_v36, %v134_v36  ;;  %v137_v40 = vadd.f32 %v181_v34, %v136_v38  ;;  %v199_v41 = vpop.f32.mrb[3].mxu0 }
 0x219   :  { %149 = vst.msk [vmem:[%s309_s5] sm:$0xf] %vm148_vm2, %v187_v39  ;;  %v188_v42 = vpack.c.bf16 %v137_v40, %v137_v40  ;;  %159 = vrot.lane.b32.xlu1 %v187_v39, %s212_s13  ;;  %151 = vrot.lane.b32.xlu0 %v187_v39, %s213_s14 }
 0x21b   :  { %150 = vst.msk [vmem:[%s309_s5 + $0x4] sm:$0xf] %vm148_vm2, %v188_v42 }
 0x21d   :  { %153 = vrot.lane.b32.xlu1 %v188_v42, %s213_s14 }
 0x221   :  { %161 = vrot.lane.b32.xlu1 %v188_v42, %s212_s13 }
 0x28b   :  { %v160_v43 = vpop.permute.xlu1 %159  ;;  %v152_v44 = vpop.permute.xlu0 %151 }
 0x28c   :  { %165 = vst.msk [vmem:[%s310_s7] sm:$0xf] %vm148_vm2, %v160_v43  ;;  %157 = vst.msk [vmem:[%s311_s6] sm:$0xf] %vm148_vm2, %v152_v44 }
 0x28f   :  { %v154_v45 = vpop.permute.xlu1 %153 }
 0x290   :  { %158 = vst.msk [vmem:[%s311_s6 + $0x4] sm:$0xf] %vm148_vm2, %v154_v45 }
 0x293   :  { %v162_v46 = vpop.permute.xlu1 %161 }
 0x294   :  { %166 = vst.msk [vmem:[%s310_s7 + $0x4] sm:$0xf] %vm148_vm2, %v162_v46 }

// kernel: encoder_forward.17
= control target key start
LH: loop header
LB: loop body
LE: loop exit
PB: predicated region body
PF: predicated region fallthrough
CT: control target
= control target key end

     0   :  { %vm17_vm0 = vcmask 261120   ;;  %s167_s0 = inlined_call_operand.vmem [shape: f32[16,32], index: 0, kind: input, shape index: {}]   ;;  %s168_s1 = inlined_call_operand.vmem [shape: f32[1,32], index: 1, kind: input, shape index: {}]   ;;  %s169_s2 = inlined_call_operand.vmem [shape: f32[1,32], index: 2, kind: input, shape index: {}]   ;;  %s170_s3 = inlined_call_operand.hbm [shape: f32[16,32], index: 3, kind: output, shape index: {}]  }
   0x1   :  { %v15_v0 = vld [vmem:[%s167_s0] sm:$0xff]  ;;  %v16_v1 = vld [vmem:[%s167_s0 + $0x8] sm:$0xff] }
   0x2   :  { %8 = vsyncpa [#allocation3], 0  ;;  %v18_v2 = vsel %vm17_vm0, %v15_v0, 0.0  ;;  %v21_v3 = vsel %vm17_vm0, %v16_v1, 0.0  ;;  %v81_v21 = vld [vmem:[%s168_s1] ss:$0 sm:$0xff] }
   0x3   :  { %19 = vadd.xlane.f32.xlu0 %v18_v2  ;;  %v82_v23 = vld [vmem:[%s169_s2] ss:$0 sm:$0xff]  ;;  %s114_s19 = smov [#allocation2]  }
   0x4   :  { %s70_s20 = sshll.u32 %s114_s19, 4  ;;  %s71_s20 = int_to_ptr.vmem [resolvable:$true] %s70_s20 }
   0x5   :  { %s90_s21 = scalar_lea.vmem %s71_s20, 256  ;;  %p95_p1 = scmp.lt.s32.totalorder %s71_s20, %s71_s20 }
   0x6   :  { %p91_p0 = scmp.ne.s32.totalorder %s71_s20, %s90_s21  ;;  %p96_p2 = scmp.lt.s32.totalorder %s90_s21, %s90_s21 }
   0x7   :  { %22 = vadd.xlane.f32.xlu0 %v21_v3 }
   0x8   :  { %p97_p3 = por %p96_p2, %p95_p1 }
   0xa   :  { %p98_p4 = pnand %p97_p3, %p91_p0 }
  0x90   :  { %v20_v4 = vpop.xlane.xlu0 %19 }
  0x91   :  { %v25_v5 = vmul.f32 0.03125, %v20_v4 }
  0x93   :  { %v27_v6 = vsub.f32 %v15_v0, %v25_v5 }
  0x94   :  { %v23_v7 = vpop.xlane.xlu0 %22 }
  0x95   :  { %v26_v8 = vmul.f32 0.03125, %v23_v7  ;;  %v29_v9 = vmul.f32 %v27_v6, %v27_v6 }
  0x97   :  { %v28_v10 = vsub.f32 %v16_v1, %v26_v8  ;;  %v31_v11 = vsel %vm17_vm0, %v29_v9, 0.0 }
  0x98   :  { %32 = vadd.xlane.f32.xlu1 %v31_v11 }
  0x99   :  { %v30_v12 = vmul.f32 %v28_v10, %v28_v10 }
  0x9b   :  { %v34_v13 = vsel %vm17_vm0, %v30_v12, 0.0 }
  0x9c   :  { %35 = vadd.xlane.f32.xlu1 %v34_v13 }
 0x125   :  { %v33_v14 = vpop.xlane.xlu1 %32 }
 0x126   :  { %v37_v15 = vmul.f32 0.03125, %v33_v14 }
 0x128   :  { %v39_v16 = vadd.f32 1e-05, %v37_v15 }
 0x129   :  { %v36_v17 = vpop.xlane.xlu1 %35 }
 0x12a   :  { %86 = vrsqrt.f32 %v39_v16  ;;  %v38_v18 = vmul.f32 0.03125, %v36_v17 }
 0x12c   :  { %v40_v19 = vadd.f32 1e-05, %v38_v18 }
 0x12e   :  { %88 = vrsqrt.f32 %v40_v19 }
 0x134   :  { %v87_v20 = vpop.eup %86 }
 0x135   :  { %v43_v22 = vmul.f32 %v87_v20, %v27_v6 }
 0x137   :  { %v52_v24 = vmul.f32 %v81_v21, %v43_v22 }
 0x138   :  { %v89_v25 = vpop.eup %88 }
 0x139   :  { %v44_v26 = vmul.f32 %v89_v25, %v28_v10  ;;  %v61_v27 = vadd.f32 %v82_v23, %v52_v24 }
 0x13b   :  { %v53_v28 = vmul.f32 %v81_v21, %v44_v26  ;;  %63 = vst.msk [vmem:[#allocation2] sm:$0xff] %vm17_vm0, %v61_v27 }
 0x13d   :  { %v62_v29 = vadd.f32 %v82_v23, %v53_v28 }
 0x13f   :  { %64 = vst.msk [vmem:[#allocation2 + $0x8] sm:$0xff] %vm17_vm0, %v62_v29 }
 0x140   :  { %101 = shalt.err (!%p98_p4)
}
 0x141   :  { %s102_s22 = scalar_lea.hbm %s170_s3, 256 }
 0x142   :  { %p103_p5 = scmp.ne.s32.totalorder %s170_s3, %s102_s22  ;;  %p106_p6 = scmp.lt.u32.totalorder %s102_s22, %s170_s3 }
 0x144   :  { %p108_p7 = pnand %p106_p6, %p103_p5 }
 0x146   :  { %111 = shalt.err (!%p108_p7)
}
 0x147   :  { %s115_s27 = smov 128   ;;  %s116_s28 = smov 8  }
 0x148   :  { %76 = dma.vmem_to_hbm [thread:$0]  %s71_s20, 256, %s170_s3, [#allocation3], %s115_s27, %s115_s27, %s116_s28  }
 0x149   :  { %112 = dma.done.wait [#allocation3], 256  }
 0x14a   :  { %113 = vsyncadd [#allocation3], 4294967040 }
 0x14b   :  { %80 = vsyncpa [#allocation3], 1 }

</bundles_post_ra>
